<compile_context>
chip_gen: v7x
topology: tpu7x:2x2x1
jax: 0.10.0
libtpu: 0.0.40
codegen_flags: <defaults>
</compile_context>

<pallas_src>
import functools

import jax
import jax.numpy as jnp
from jax.experimental import pallas as pl
from jax.experimental.pallas import tpu as pltpu

_LANES = 128
_NEG_BIG = -1e30   # pads unused logit lanes: exp() underflows to 0, no NaNs (f32 only)
_BN_EPS = 1e-5


def _round_up(n, m):
    return ((n + m - 1) // m) * m


def _net_kernel(x_ref, p_ref, w1_ref, w2_ref, o_ref, *, n_input, n_output):
    """Whole batch in one shot: BN (batch stats) -> Linear -> tanh -> Linear -> log_softmax."""
    x = x_ref[...]                       # (B, n_input) f32
    p = p_ref[...]                       # (4, L): gamma | beta | b1 | b2 (lane-padded)
    gamma = p[0:1, :n_input]
    beta = p[1:2, :n_input]
    b1 = p[2:3, :]
    b2 = p[3:4, :]

    # BatchNorm1d training-mode semantics: biased batch variance, eps = 1e-5.
    mean = jnp.mean(x, axis=0, keepdims=True)                   # (1, n_input)
    var = jnp.mean(jnp.square(x - mean), axis=0, keepdims=True)
    scale = gamma * jax.lax.rsqrt(var + _BN_EPS)
    shift = beta - mean * scale
    x_bn = x * scale + shift

    # Hidden Linear + tanh (MXU matmul, f32 accumulate; tanh on the EUP).
    h = jnp.tanh(jnp.dot(x_bn, w1_ref[...], preferred_element_type=jnp.float32) + b1)

    # Output Linear; padded logit lanes sit at ~-1e30 (zero weight column + -1e30 bias).
    logits = jnp.dot(h, w2_ref[...], preferred_element_type=jnp.float32) + b2

    # log_softmax over the lane axis; padded lanes contribute exp() == 0.
    m = jnp.max(logits, axis=-1, keepdims=True)
    shifted = logits - m
    lse = jnp.log(jnp.sum(jnp.exp(shifted), axis=-1, keepdims=True))

    # Store only the real output columns -> no padded slab writeback, no wrapper slice.
    o_ref[...] = (shifted - lse)[:, :n_output]


def prepare_params(gamma, beta, w1, b1, w2, b2):
    """One-time packing of the (static) layer params into lane-dense slabs."""
    n_input, n_hidden = w1.shape
    n_output = w2.shape[1]
    L = _round_up(max(n_hidden, n_output), _LANES)

    w1p = jnp.zeros((n_input, L), jnp.float32).at[:, :n_hidden].set(w1)
    w2p = jnp.zeros((L, L), jnp.float32).at[:n_hidden, :n_output].set(w2)

    # Single (4, L) slab: gamma | beta | b1 | b2  (one DMA instead of three).
    p = jnp.zeros((4, L), jnp.float32)
    p = p.at[0, :n_input].set(gamma)
    p = p.at[1, :n_input].set(beta)
    p = p.at[2, :n_hidden].set(b1)
    p = p.at[3, :].set(_NEG_BIG)
    p = p.at[3, :n_output].set(b2)
    return p, w1p, w2p, n_output


@functools.partial(jax.jit, static_argnames=("n_output",))
def net_forward(x, params, w1p, w2p, *, n_output):
    """x: (B, n_input) f32 -> log-probabilities (B, n_output) f32."""
    B, n_input = x.shape
    kernel = functools.partial(_net_kernel, n_input=n_input, n_output=n_output)

    # No grid: all four inputs and the output are whole-array VMEM residents
    # (~150 KiB total), so there is no per-grid-step overhead and no pipelining
    # machinery to pay for.
    vmem = pl.BlockSpec(memory_space=pltpu.MemorySpace.VMEM)
    return pl.pallas_call(
        kernel,
        out_shape=jax.ShapeDtypeStruct((B, n_output), jnp.float32),
        in_specs=[vmem, vmem, vmem, vmem],
        out_specs=vmem,
    )(x, params, w1p, w2p)


def _init_params(key, n_input, n_hidden, n_output):
    """Deterministic init mirroring torch defaults (uniform fan-in); BN affine randomized
    slightly so the gamma/beta path is actually exercised by the correctness check."""
    k1, k2, k3, k4, k5, k6 = jax.random.split(key, 6)
    lim1 = 1.0 / jnp.sqrt(n_input)
    lim2 = 1.0 / jnp.sqrt(n_hidden)
    w1 = jax.random.uniform(k1, (n_input, n_hidden), jnp.float32, -lim1, lim1)
    b1 = jax.random.uniform(k2, (n_hidden,), jnp.float32, -lim1, lim1)
    w2 = jax.random.uniform(k3, (n_hidden, n_output), jnp.float32, -lim2, lim2)
    b2 = jax.random.uniform(k4, (n_output,), jnp.float32, -lim2, lim2)
    gamma = 1.0 + 0.1 * jax.random.normal(k5, (n_input,), jnp.float32)
    beta = 0.1 * jax.random.normal(k6, (n_input,), jnp.float32)
    return gamma, beta, w1, b1, w2, b2


def _reference(x, gamma, beta, w1, b1, w2, b2):
    """Pure-JAX reference of the PyTorch forward (training-mode BatchNorm1d)."""
    mean = jnp.mean(x, axis=0)
    var = jnp.mean(jnp.square(x - mean), axis=0)
    x_bn = (x - mean) * jax.lax.rsqrt(var + _BN_EPS) * gamma + beta
    h = jnp.tanh(x_bn @ w1 + b1)
    logits = h @ w2 + b2
    return jax.nn.log_softmax(logits, axis=-1)


if __name__ == "__main__":
    B, n_input, n_hidden, n_output = 256, 32, 64, 16

    key = jax.random.PRNGKey(0)
    kx, kp = jax.random.split(key)
    x = jax.random.normal(kx, (B, n_input), jnp.float32)
    gamma, beta, w1, b1, w2, b2 = _init_params(kp, n_input, n_hidden, n_output)

    params, w1p, w2p, n_out = prepare_params(gamma, beta, w1, b1, w2, b2)
    out = net_forward(x, params, w1p, w2p, n_output=n_out)
    jax.block_until_ready(out)

    # Correctness checks against the pure-JAX reference + log_softmax sanity.
    ref = _reference(x, gamma, beta, w1, b1, w2, b2)
    assert out.shape == (B, n_output)
    assert bool(jnp.all(jnp.abs(out - ref) < 1e-3))
    row_sums = jnp.sum(jnp.exp(out), axis=-1)
    assert bool(jnp.all(jnp.abs(row_sums - 1.0) < 1e-4))

    print("KERNEL_OK")
</pallas_src>

<mosaic_0001>
module attributes {stable_mosaic.version = 11 : i64} {
  func.func @_net_kernel(%arg0: memref<256x32xf32, #tpu.memory_space<vmem>>, %arg1: memref<4x128xf32, #tpu.memory_space<vmem>>, %arg2: memref<32x128xf32, #tpu.memory_space<vmem>>, %arg3: memref<128x128xf32, #tpu.memory_space<vmem>>, %arg4: memref<256x16xf32, #tpu.memory_space<vmem>>) attributes {dimension_semantics = [], scalar_prefetch = 0 : i64, scratch_operands = 0 : i64, tpu.core_type = #tpu.core_type<tc>} {
    %c0 = arith.constant 0 : index
    %c0_0 = arith.constant 0 : index
    %0 = vector.load %arg0[%c0, %c0_0] : memref<256x32xf32, #tpu.memory_space<vmem>>, vector<256x32xf32>
    %c0_1 = arith.constant 0 : index
    %c0_2 = arith.constant 0 : index
    %1 = vector.load %arg1[%c0_1, %c0_2] : memref<4x128xf32, #tpu.memory_space<vmem>>, vector<4x128xf32>
    %2 = vector.extract_strided_slice %1 {offsets = [0, 0], sizes = [1, 32], strides = [1, 1]} : vector<4x128xf32> to vector<1x32xf32>
    %3 = vector.extract_strided_slice %1 {offsets = [1, 0], sizes = [1, 32], strides = [1, 1]} : vector<4x128xf32> to vector<1x32xf32>
    %4 = vector.extract_strided_slice %1 {offsets = [2, 0], sizes = [1, 128], strides = [1, 1]} : vector<4x128xf32> to vector<1x128xf32>
    %5 = vector.extract_strided_slice %1 {offsets = [3, 0], sizes = [1, 128], strides = [1, 1]} : vector<4x128xf32> to vector<1x128xf32>
    %cst = arith.constant dense<0.000000e+00> : vector<32xf32>
    %6 = vector.multi_reduction <add>, %0, %cst [0] : vector<256x32xf32> to vector<32xf32>
    %7 = vector.shape_cast %6 : vector<32xf32> to vector<1x32xf32>
    %cst_3 = arith.constant 2.560000e+02 : f32
    %8 = vector.broadcast %cst_3 : f32 to vector<1x32xf32>
    %9 = arith.divf %7, %8 : vector<1x32xf32>
    %10 = vector.broadcast %9 : vector<1x32xf32> to vector<256x32xf32>
    %11 = arith.subf %0, %10 : vector<256x32xf32>
    %12 = arith.mulf %11, %11 : vector<256x32xf32>
    %cst_4 = arith.constant dense<0.000000e+00> : vector<32xf32>
    %13 = vector.multi_reduction <add>, %12, %cst_4 [0] : vector<256x32xf32> to vector<32xf32>
    %14 = vector.shape_cast %13 : vector<32xf32> to vector<1x32xf32>
    %cst_5 = arith.constant 2.560000e+02 : f32
    %15 = vector.broadcast %cst_5 : f32 to vector<1x32xf32>
    %16 = arith.divf %14, %15 : vector<1x32xf32>
    %cst_6 = arith.constant 9.99999974E-6 : f32
    %17 = vector.broadcast %cst_6 : f32 to vector<1x32xf32>
    %18 = arith.addf %16, %17 : vector<1x32xf32>
    %19 = math.rsqrt %18 : vector<1x32xf32>
    %20 = arith.mulf %2, %19 : vector<1x32xf32>
    %21 = arith.mulf %9, %20 : vector<1x32xf32>
    %22 = arith.subf %3, %21 : vector<1x32xf32>
    %23 = vector.broadcast %20 : vector<1x32xf32> to vector<256x32xf32>
    %24 = arith.mulf %0, %23 : vector<256x32xf32>
    %25 = vector.broadcast %22 : vector<1x32xf32> to vector<256x32xf32>
    %26 = arith.addf %24, %25 : vector<256x32xf32>
    %c0_7 = arith.constant 0 : index
    %c0_8 = arith.constant 0 : index
    %27 = vector.load %arg2[%c0_7, %c0_8] : memref<32x128xf32, #tpu.memory_space<vmem>>, vector<32x128xf32>
    %cst_9 = arith.constant dense<0.000000e+00> : vector<256x128xf32>
    %28 = tpu.matmul %26, %27, %cst_9 {dimension_numbers = #tpu.dot_dimension_numbers<[1], [0], [0], [1], [0, 0, 1, 1], [], []>} : vector<256x32xf32>, vector<32x128xf32>, vector<256x128xf32> -> vector<256x128xf32>
    %29 = vector.broadcast %4 : vector<1x128xf32> to vector<256x128xf32>
    %30 = arith.addf %28, %29 : vector<256x128xf32>
    %31 = math.tanh %30 : vector<256x128xf32>
    %c0_10 = arith.constant 0 : index
    %c0_11 = arith.constant 0 : index
    %32 = vector.load %arg3[%c0_10, %c0_11] : memref<128x128xf32, #tpu.memory_space<vmem>>, vector<128x128xf32>
    %cst_12 = arith.constant dense<0.000000e+00> : vector<256x128xf32>
    %33 = tpu.matmul %31, %32, %cst_12 {dimension_numbers = #tpu.dot_dimension_numbers<[1], [0], [0], [1], [0, 0, 1, 1], [], []>} : vector<256x128xf32>, vector<128x128xf32>, vector<256x128xf32> -> vector<256x128xf32>
    %34 = vector.broadcast %5 : vector<1x128xf32> to vector<256x128xf32>
    %35 = arith.addf %33, %34 : vector<256x128xf32>
    %cst_13 = arith.constant dense<0xFF800000> : vector<256xf32>
    %36 = vector.multi_reduction <maximumf>, %35, %cst_13 [1] : vector<256x128xf32> to vector<256xf32>
    %37 = vector.shape_cast %36 : vector<256xf32> to vector<256x1xf32>
    %38 = vector.broadcast %37 : vector<256x1xf32> to vector<256x128xf32>
    %39 = arith.subf %35, %38 : vector<256x128xf32>
    %40 = math.exp %39 : vector<256x128xf32>
    %cst_14 = arith.constant dense<0.000000e+00> : vector<256xf32>
    %41 = vector.multi_reduction <add>, %40, %cst_14 [1] : vector<256x128xf32> to vector<256xf32>
    %42 = vector.shape_cast %41 : vector<256xf32> to vector<256x1xf32>
    %43 = math.log %42 : vector<256x1xf32>
    %44 = vector.broadcast %43 : vector<256x1xf32> to vector<256x128xf32>
    %45 = arith.subf %39, %44 : vector<256x128xf32>
    %46 = vector.extract_strided_slice %45 {offsets = [0, 0], sizes = [256, 16], strides = [1, 1]} : vector<256x128xf32> to vector<256x16xf32>
    %c0_15 = arith.constant 0 : index
    %c0_16 = arith.constant 0 : index
    %47 = vector.load %arg4[%c0_15, %c0_16] : memref<256x16xf32, #tpu.memory_space<vmem>>, vector<256x16xf32>
    tpu.vector_store %arg4[%c0_15, %c0_16], %46 {strides = array<i32>} : memref<256x16xf32, #tpu.memory_space<vmem>>, vector<256x16xf32>,
    return
  }
}

</mosaic_0001>

<bundles_post_ra>
// kernel: net_forward.1
= control target key start
LH: loop header
LB: loop body
LE: loop exit
PB: predicated region body
PF: predicated region fallthrough
CT: control target
= control target key end

     0   :  { %vm50_vm0 = vcmask 261120   ;;  %vm1262_vm1 = vcmask 130048   ;;  %s2850_s2 = inlined_call_operand.vmem [shape: f32[32,128], index: 2, kind: input, shape index: {}]   ;;  %s2851_s0 = inlined_call_operand.vmem [shape: f32[256,32], index: 0, kind: input, shape index: {}]   ;;  %s2852_s3 = inlined_call_operand.vmem [shape: f32[128,128], index: 3, kind: input, shape index: {}]   ;;  %s2853_s1 = inlined_call_operand.vmem [shape: f32[4,128], index: 1, kind: input, shape index: {}]   ;;  %s2854_s4 = inlined_call_operand.vmem [shape: f32[256,16], index: 4, kind: output, shape index: {}]  }
   0x1   :  { %v336_v0 = vld [vmem:[%s2850_s2] sm:$0xff]  ;;  %v337_v1 = vld [vmem:[%s2850_s2 + $0x8] sm:$0xff]  ;;  %v338_v2 = vld [vmem:[%s2850_s2 + $0x10] sm:$0xff] }
   0x2   :  { %v1551_v3 = vpack.c.bf16 %v337_v1, %v336_v0  ;;  %v339_v4 = vld [vmem:[%s2850_s2 + $0x18] sm:$0xff]  ;;  %v1841_v5 = vld [vmem:[%s2851_s0] sm:$0xff]  ;;  %v1846_v6 = vld [vmem:[%s2851_s0 + $0x8] sm:$0xff] }
   0x3   :  { %v1555_v7 = vpack.c.bf16 %v339_v4, %v338_v2  ;;  %v1851_v8 = vld [vmem:[%s2851_s0 + $0x10] sm:$0xff]  ;;  %v1856_v9 = vld [vmem:[%s2851_s0 + $0x18] sm:$0xff]  ;;  %v51_v10 = vsel %vm50_vm0, %v1841_v5, 0.0  ;;  %v52_v11 = vsel %vm50_vm0, %v1846_v6, 0.0  ;;  %v1865_v12 = vld [vmem:[%s2851_s0 + $0x20] sm:$0xff] }
   0x4   :  { %1552 = vmatprep.subr.bf16.mxu0 %v1551_v3  ;;  %v53_v13 = vadd.f32 %v52_v11, %v51_v10  ;;  %v54_v14 = vsel %vm50_vm0, %v1851_v8, 0.0  ;;  %v56_v15 = vsel %vm50_vm0, %v1856_v9, 0.0  ;;  %v1874_v16 = vld [vmem:[%s2851_s0 + $0x28] sm:$0xff]  ;;  %v58_v18 = vsel %vm50_vm0, %v1865_v12, 0.0  ;;  %v1881_v19 = vld [vmem:[%s2851_s0 + $0x30] sm:$0xff]  ;;  %v1888_v22 = vld [vmem:[%s2851_s0 + $0x38] sm:$0xff] }
   0x5   :  { %1554 = vmatpush3.bf16.msra.mxu0 %v1551_v3  ;;  %v60_v21 = vsel %vm50_vm0, %v1874_v16, 0.0  ;;  %v62_v24 = vsel %vm50_vm0, %v1881_v19, 0.0  ;;  %v1895_v25 = vld [vmem:[%s2851_s0 + $0x40] sm:$0xff]  ;;  %v64_v27 = vsel %vm50_vm0, %v1888_v22, 0.0  ;;  %v1902_v28 = vld [vmem:[%s2851_s0 + $0x48] sm:$0xff]  ;;  %v1909_v31 = vld [vmem:[%s2851_s0 + $0x50] sm:$0xff] }
   0x6   :  { %1556 = vmatprep.subr.bf16.mxu0 %v1555_v7  ;;  %v55_v17 = vadd.f32 %v54_v14, %v53_v13  ;;  %v66_v30 = vsel %vm50_vm0, %v1895_v25, 0.0  ;;  %v68_v33 = vsel %vm50_vm0, %v1902_v28, 0.0  ;;  %v1916_v34 = vld [vmem:[%s2851_s0 + $0x58] sm:$0xff]  ;;  %v70_v36 = vsel %vm50_vm0, %v1909_v31, 0.0  ;;  %v1923_v37 = vld [vmem:[%s2851_s0 + $0x60] sm:$0xff]  ;;  %v1930_v40 = vld [vmem:[%s2851_s0 + $0x68] sm:$0xff] }
   0x7   :  { %v72_v39 = vsel %vm50_vm0, %v1916_v34, 0.0  ;;  %v74_v42 = vsel %vm50_vm0, %v1923_v37, 0.0  ;;  %v1937_v43 = vld [vmem:[%s2851_s0 + $0x70] sm:$0xff]  ;;  %v76_v45 = vsel %vm50_vm0, %v1930_v40, 0.0  ;;  %v1944_v46 = vld [vmem:[%s2851_s0 + $0x78] sm:$0xff]  ;;  %v1951_v49 = vld [vmem:[%s2851_s0 + $0x80] sm:$0xff] }
   0x8   :  { %v57_v20 = vadd.f32 %v56_v15, %v55_v17  ;;  %v78_v48 = vsel %vm50_vm0, %v1937_v43, 0.0  ;;  %v80_v51 = vsel %vm50_vm0, %v1944_v46, 0.0  ;;  %v1958_v52 = vld [vmem:[%s2851_s0 + $0x88] sm:$0xff]  ;;  %v82_v54 = vsel %vm50_vm0, %v1951_v49, 0.0  ;;  %v1965_v55 = vld [vmem:[%s2851_s0 + $0x90] sm:$0xff]  ;;  %v1972_v58 = vld [vmem:[%s2851_s0 + $0x98] sm:$0xff] }
   0x9   :  { %1558 = vmatpush3.bf16.msra.mxu0 %v1555_v7  ;;  %v84_v57 = vsel %vm50_vm0, %v1958_v52, 0.0  ;;  %v86_v60 = vsel %vm50_vm0, %v1965_v55, 0.0  ;;  %v1979_v61 = vld [vmem:[%s2851_s0 + $0xa0] sm:$0xff]  ;;  %v88_v63 = vsel %vm50_vm0, %v1972_v58, 0.0  ;;  %v1986_v0 = vld [vmem:[%s2851_s0 + $0xa8] sm:$0xff]  ;;  %v1993_v3 = vld [vmem:[%s2851_s0 + $0xb0] sm:$0xff] }
   0xa   :  { %v59_v23 = vadd.f32 %v58_v18, %v57_v20  ;;  %v90_v2 = vsel %vm50_vm0, %v1979_v61, 0.0  ;;  %v92_v7 = vsel %vm50_vm0, %v1986_v0, 0.0  ;;  %v2000_v10 = vld [vmem:[%s2851_s0 + $0xb8] sm:$0xff]  ;;  %v94_v13 = vsel %vm50_vm0, %v1993_v3, 0.0  ;;  %v2007_v14 = vld [vmem:[%s2851_s0 + $0xc0] sm:$0xff]  ;;  %v2014_v18 = vld [vmem:[%s2851_s0 + $0xc8] sm:$0xff] }
   0xb   :  { %v96_v17 = vsel %vm50_vm0, %v2000_v10, 0.0 }
   0xc   :  { %v61_v26 = vadd.f32 %v60_v21, %v59_v23  ;;  %v98_v21 = vsel %vm50_vm0, %v2007_v14, 0.0  ;;  %v2021_v23 = vld [vmem:[%s2851_s0 + $0xd0] sm:$0xff] }
   0xe   :  { %v63_v29 = vadd.f32 %v62_v24, %v61_v26  ;;  %v100_v26 = vsel %vm50_vm0, %v2014_v18, 0.0 }
  0x10   :  { %v65_v32 = vadd.f32 %v64_v27, %v63_v29  ;;  %v2028_v27 = vld [vmem:[%s2851_s0 + $0xd8] sm:$0xff] }
  0x12   :  { %v67_v35 = vadd.f32 %v66_v30, %v65_v32  ;;  %v102_v30 = vsel %vm50_vm0, %v2021_v23, 0.0  ;;  %v2035_v32 = vld [vmem:[%s2851_s0 + $0xe0] sm:$0xff] }
  0x14   :  { %v69_v38 = vadd.f32 %v68_v33, %v67_v35  ;;  %v104_v35 = vsel %vm50_vm0, %v2028_v27, 0.0 }
  0x16   :  { %v71_v41 = vadd.f32 %v70_v36, %v69_v38  ;;  %v2042_v36 = vld [vmem:[%s2851_s0 + $0xe8] sm:$0xff] }
  0x18   :  { %v73_v44 = vadd.f32 %v72_v39, %v71_v41  ;;  %v106_v39 = vsel %vm50_vm0, %v2035_v32, 0.0  ;;  %v2049_v41 = vld [vmem:[%s2851_s0 + $0xf0] sm:$0xff] }
  0x1a   :  { %v75_v47 = vadd.f32 %v74_v42, %v73_v44  ;;  %v108_v44 = vsel %vm50_vm0, %v2042_v36, 0.0 }
  0x1c   :  { %v77_v50 = vadd.f32 %v76_v45, %v75_v47  ;;  %v2056_v45 = vld [vmem:[%s2851_s0 + $0xf8] sm:$0xff] }
  0x1e   :  { %v79_v53 = vadd.f32 %v78_v48, %v77_v50  ;;  %v110_v48 = vsel %vm50_vm0, %v2049_v41, 0.0 }
  0x20   :  { %v81_v56 = vadd.f32 %v80_v51, %v79_v53  ;;  %v112_v51 = vsel %vm50_vm0, %v2056_v45, 0.0 }
  0x22   :  { %v83_v59 = vadd.f32 %v82_v54, %v81_v56 }
  0x24   :  { %v85_v62 = vadd.f32 %v84_v57, %v83_v59 }
  0x26   :  { %v87_v1 = vadd.f32 %v86_v60, %v85_v62 }
  0x28   :  { %v89_v4 = vadd.f32 %v88_v63, %v87_v1 }
  0x2a   :  { %v91_v11 = vadd.f32 %v90_v2, %v89_v4 }
  0x2c   :  { %v93_v15 = vadd.f32 %v92_v7, %v91_v11 }
  0x2e   :  { %v95_v20 = vadd.f32 %v94_v13, %v93_v15 }
  0x30   :  { %v97_v24 = vadd.f32 %v96_v17, %v95_v20 }
  0x32   :  { %v99_v29 = vadd.f32 %v98_v21, %v97_v24 }
  0x34   :  { %v101_v33 = vadd.f32 %v100_v26, %v99_v29 }
  0x36   :  { %v103_v38 = vadd.f32 %v102_v30, %v101_v33 }
  0x38   :  { %v105_v42 = vadd.f32 %v104_v35, %v103_v38 }
  0x3a   :  { %v107_v47 = vadd.f32 %v106_v39, %v105_v42 }
  0x3c   :  { %v109_v50 = vadd.f32 %v108_v44, %v107_v47 }
  0x3e   :  { %v111_v53 = vadd.f32 %v110_v48, %v109_v50 }
  0x40   :  { %v113_v54 = vadd.f32 %v112_v51, %v111_v53 }
  0x42   :  { %v114_v56 = vrot.slane %v113_v54, 4 }
  0x44   :  { %v115_v57 = vadd.f32 %v114_v56, %v113_v54 }
  0x46   :  { %v116_v59 = vrot.slane %v115_v57, 2 }
  0x48   :  { %v117_v60 = vadd.f32 %v116_v59, %v115_v57 }
  0x4a   :  { %v118_v62 = vrot.slane %v117_v60, 1 }
  0x4c   :  { %v119_v63 = vadd.f32 %v118_v62, %v117_v60 }
  0x4e   :  { %v2062_v1 = vmul.f32 0.00390625, %v119_v63 }
  0x50   :  { %v122_v2 = vsub.f32 %v1841_v5, %v2062_v1  ;;  %v123_v4 = vsub.f32 %v1846_v6, %v2062_v1  ;;  %v124_v7 = vsub.f32 %v1851_v8, %v2062_v1  ;;  %v125_v11 = vsub.f32 %v1856_v9, %v2062_v1 }
  0x51   :  { %v126_v13 = vsub.f32 %v1865_v12, %v2062_v1  ;;  %v127_v21 = vsub.f32 %v1874_v16, %v2062_v1  ;;  %v128_v26 = vsub.f32 %v1881_v19, %v2062_v1  ;;  %v129_v39 = vsub.f32 %v1888_v22, %v2062_v1 }
  0x52   :  { %v154_v15 = vmul.f32 %v122_v2, %v122_v2  ;;  %v155_v17 = vmul.f32 %v123_v4, %v123_v4  ;;  %v156_v20 = vmul.f32 %v124_v7, %v124_v7  ;;  %v157_v24 = vmul.f32 %v125_v11, %v125_v11 }
  0x53   :  { %v158_v29 = vmul.f32 %v126_v13, %v126_v13  ;;  %v159_v42 = vmul.f32 %v127_v21, %v127_v21  ;;  %v130_v48 = vsub.f32 %v1895_v25, %v2062_v1  ;;  %v160_v50 = vmul.f32 %v128_v26, %v128_v26 }
  0x54   :  { %v186_v30 = vsel %vm50_vm0, %v154_v15, 0.0  ;;  %v187_v33 = vsel %vm50_vm0, %v155_v17, 0.0  ;;  %v189_v35 = vsel %vm50_vm0, %v156_v20, 0.0  ;;  %v191_v44 = vsel %vm50_vm0, %v157_v24, 0.0 }
  0x55   :  { %v188_v38 = vadd.f32 %v187_v33, %v186_v30  ;;  %v193_v51 = vsel %vm50_vm0, %v158_v29, 0.0  ;;  %v131_v54 = vsub.f32 %v1902_v28, %v2062_v1  ;;  %v161_v56 = vmul.f32 %v129_v39, %v129_v39 }
  0x56   :  { %v195_v57 = vsel %vm50_vm0, %v159_v42, 0.0  ;;  %v132_v60 = vsub.f32 %v1909_v31, %v2062_v1  ;;  %v162_v62 = vmul.f32 %v130_v48, %v130_v48  ;;  %v197_v63 = vsel %vm50_vm0, %v160_v50, 0.0 }
  0x57   :  { %v190_v47 = vadd.f32 %v189_v35, %v188_v38  ;;  %v133_v4 = vsub.f32 %v1916_v34, %v2062_v1  ;;  %v163_v7 = vmul.f32 %v131_v54, %v131_v54  ;;  %v199_v11 = vsel %vm50_vm0, %v161_v56, 0.0 }
  0x58   :  { %v134_v15 = vsub.f32 %v1923_v37, %v2062_v1  ;;  %v164_v17 = vmul.f32 %v132_v60, %v132_v60  ;;  %v201_v20 = vsel %vm50_vm0, %v162_v62, 0.0  ;;  %v135_v24 = vsub.f32 %v1930_v40, %v2062_v1 }
  0x59   :  { %v192_v53 = vadd.f32 %v191_v44, %v190_v47  ;;  %v165_v26 = vmul.f32 %v133_v4, %v133_v4  ;;  %v203_v29 = vsel %vm50_vm0, %v163_v7, 0.0  ;;  %v136_v33 = vsub.f32 %v1937_v43, %v2062_v1 }
  0x5a   :  { %v166_v35 = vmul.f32 %v134_v15, %v134_v15  ;;  %v205_v38 = vsel %vm50_vm0, %v164_v17, 0.0  ;;  %v137_v42 = vsub.f32 %v1944_v46, %v2062_v1  ;;  %v167_v44 = vmul.f32 %v135_v24, %v135_v24 }
  0x5b   :  { %v194_v59 = vadd.f32 %v193_v51, %v192_v53  ;;  %v207_v47 = vsel %vm50_vm0, %v165_v26, 0.0  ;;  %v138_v50 = vsub.f32 %v1951_v49, %v2062_v1  ;;  %v168_v51 = vmul.f32 %v136_v33, %v136_v33 }
  0x5c   :  { %v209_v53 = vsel %vm50_vm0, %v166_v35, 0.0  ;;  %v139_v56 = vsub.f32 %v1958_v52, %v2062_v1  ;;  %v140_v62 = vsub.f32 %v1965_v55, %v2062_v1  ;;  %v141_v7 = vsub.f32 %v1972_v58, %v2062_v1 }
  0x5d   :  { %v196_v2 = vadd.f32 %v195_v57, %v194_v59  ;;  %v169_v57 = vmul.f32 %v137_v42, %v137_v42  ;;  %v211_v59 = vsel %vm50_vm0, %v167_v44, 0.0  ;;  %v142_v17 = vsub.f32 %v1979_v61, %v2062_v1 }
  0x5e   :  { %v143_v26 = vsub.f32 %v1986_v0, %v2062_v1  ;;  %v144_v35 = vsub.f32 %v1993_v3, %v2062_v1  ;;  %v145_v44 = vsub.f32 %v2000_v10, %v2062_v1 }
  0x5f   :  { %v198_v13 = vadd.f32 %v197_v63, %v196_v2  ;;  %v170_v63 = vmul.f32 %v138_v50, %v138_v50  ;;  %v213_v2 = vsel %vm50_vm0, %v168_v51, 0.0  ;;  %v146_v51 = vsub.f32 %v2007_v14, %v2062_v1 }
  0x61   :  { %v200_v21 = vadd.f32 %v199_v11, %v198_v13  ;;  %v171_v11 = vmul.f32 %v139_v56, %v139_v56  ;;  %v215_v13 = vsel %vm50_vm0, %v169_v57, 0.0  ;;  %v697_v56 = vld [vmem:[%s2852_s3] sm:$0xff]  ;;  %v698_v57 = vld [vmem:[%s2852_s3 + $0x8] sm:$0xff] }
  0x63   :  { %v202_v30 = vadd.f32 %v201_v20, %v200_v21  ;;  %v172_v20 = vmul.f32 %v140_v62, %v140_v62  ;;  %v217_v21 = vsel %vm50_vm0, %v170_v63, 0.0  ;;  %v2144_v62 = vpack.c.bf16 %v698_v57, %v697_v56  ;;  %v700_v63 = vld [vmem:[%s2852_s3 + $0x18] sm:$0xff] }
  0x65   :  { %v204_v39 = vadd.f32 %v203_v29, %v202_v30  ;;  %v173_v29 = vmul.f32 %v141_v7, %v141_v7  ;;  %v219_v30 = vsel %vm50_vm0, %v171_v11, 0.0  ;;  %1560 = vmatprep.subr.bf16.mxu0 %v2144_v62  ;;  %1591 = vmatprep.subr.bf16.mxu1 %v2144_v62 }
  0x66   :  { %1599 = vmatpush3.bf16.msra.mxu1 %v2144_v62 }
  0x67   :  { %v206_v48 = vadd.f32 %v205_v38, %v204_v39  ;;  %v174_v38 = vmul.f32 %v142_v17, %v142_v17  ;;  %v221_v39 = vsel %vm50_vm0, %v172_v20, 0.0  ;;  %v178_v17 = vmul.f32 %v146_v51, %v146_v51 }
  0x68   :  { %v151_v51 = vsub.f32 %v2042_v36, %v2062_v1 }
  0x69   :  { %v208_v54 = vadd.f32 %v207_v47, %v206_v48  ;;  %v175_v47 = vmul.f32 %v143_v26, %v143_v26  ;;  %v223_v48 = vsel %vm50_vm0, %v173_v29, 0.0  ;;  %v149_v29 = vsub.f32 %v2028_v27, %v2062_v1 }
  0x6b   :  { %v210_v60 = vadd.f32 %v209_v53, %v208_v54  ;;  %v176_v53 = vmul.f32 %v144_v35, %v144_v35  ;;  %v225_v54 = vsel %vm50_vm0, %v174_v38, 0.0  ;;  %v227_v7 = vsel %vm50_vm0, %v175_v47, 0.0  ;;  %v703_v47 = vld [vmem:[%s2852_s3 + $0x30] sm:$0xff] }
  0x6d   :  { %v212_v4 = vadd.f32 %v211_v59, %v210_v60  ;;  %v699_v59 = vld [vmem:[%s2852_s3 + $0x10] sm:$0xff]  ;;  %v229_v20 = vsel %vm50_vm0, %v176_v53, 0.0  ;;  %v181_v53 = vmul.f32 %v149_v29, %v149_v29 }
  0x6e   :  { %v707_v29 = vld [vmem:[%s2852_s3 + $0x50] sm:$0xff] }
  0x6f   :  { %v214_v15 = vadd.f32 %v213_v2, %v212_v4  ;;  %v147_v2 = vsub.f32 %v2014_v18, %v2062_v1  ;;  %v177_v4 = vmul.f32 %v145_v44, %v145_v44  ;;  %v233_v44 = vsel %vm50_vm0, %v178_v17, 0.0 }
  0x70   :  { %v239_v17 = vsel %vm50_vm0, %v181_v53, 0.0 }
  0x71   :  { %v216_v24 = vadd.f32 %v215_v13, %v214_v15  ;;  %v2153_v13 = vpack.c.bf16 %v700_v63, %v699_v59  ;;  %v148_v15 = vsub.f32 %v2021_v23, %v2062_v1  ;;  %v152_v59 = vsub.f32 %v2049_v41, %v2062_v1 }
  0x73   :  { %v218_v33 = vadd.f32 %v217_v21, %v216_v24  ;;  %v701_v21 = vld [vmem:[%s2852_s3 + $0x20] sm:$0xff]  ;;  %v702_v24 = vld [vmem:[%s2852_s3 + $0x28] sm:$0xff]  ;;  %1592 = vmatprep.subr.bf16.mxu1 %v2153_v13 }
  0x74   :  { %v2170_v38 = vpack.c.bf16 %v702_v24, %v701_v21  ;;  %1600 = vmatpush3.bf16.msra.mxu1 %v2153_v13  ;;  %v184_v24 = vmul.f32 %v152_v59, %v152_v59 }
  0x75   :  { %v220_v42 = vadd.f32 %v219_v30, %v218_v33  ;;  %v179_v30 = vmul.f32 %v147_v2, %v147_v2  ;;  %v231_v33 = vsel %vm50_vm0, %v177_v4, 0.0  ;;  %v705_v2 = vld [vmem:[%s2852_s3 + $0x40] sm:$0xff]  ;;  %v706_v4 = vld [vmem:[%s2852_s3 + $0x48] sm:$0xff] }
  0x76   :  { %1593 = vmatprep.subr.bf16.mxu1 %v2170_v38  ;;  %v2202_v21 = vpack.c.bf16 %v706_v4, %v705_v2 }
  0x77   :  { %v222_v50 = vadd.f32 %v221_v39, %v220_v42  ;;  %v150_v39 = vsub.f32 %v2035_v32, %v2062_v1  ;;  %v180_v42 = vmul.f32 %v148_v15, %v148_v15  ;;  %v183_v15 = vmul.f32 %v151_v51, %v151_v51 }
  0x78   :  { %1601 = vmatpush3.bf16.msra.mxu1 %v2170_v38 }
  0x79   :  { %v224_v60 = vadd.f32 %v223_v48, %v222_v50  ;;  %v704_v48 = vld [vmem:[%s2852_s3 + $0x38] sm:$0xff]  ;;  %v237_v63 = vsel %vm50_vm0, %v180_v42, 0.0 }
  0x7a   :  { %v2186_v57 = vpack.c.bf16 %v704_v48, %v703_v47  ;;  %v245_v47 = vsel %vm50_vm0, %v184_v24, 0.0  ;;  %v709_v48 = vld [vmem:[%s2852_s3 + $0x60] sm:$0xff] }
  0x7b   :  { %v226_v11 = vadd.f32 %v225_v54, %v224_v60  ;;  %v235_v54 = vsel %vm50_vm0, %v179_v30, 0.0  ;;  %v182_v60 = vmul.f32 %v150_v39, %v150_v39  ;;  %v708_v30 = vld [vmem:[%s2852_s3 + $0x58] sm:$0xff]  ;;  %v243_v39 = vsel %vm50_vm0, %v183_v15, 0.0 }
  0x7c   :  { %1594 = vmatprep.subr.bf16.mxu1 %v2186_v57 }
  0x7d   :  { %v228_v26 = vadd.f32 %v227_v7, %v226_v11  ;;  %v153_v11 = vsub.f32 %v2056_v45, %v2062_v1  ;;  %1602 = vmatpush3.bf16.msra.mxu1 %v2186_v57 }
  0x7e   :  { %1595 = vmatprep.subr.bf16.mxu1 %v2202_v21 }
  0x7f   :  { %v230_v35 = vadd.f32 %v229_v20, %v228_v26  ;;  %v241_v26 = vsel %vm50_vm0, %v182_v60, 0.0 }
  0x81   :  { %v232_v50 = vadd.f32 %v231_v33, %v230_v35  ;;  %v185_v35 = vmul.f32 %v153_v11, %v153_v11  ;;  %1603 = vmatpush3.bf16.msra.mxu1 %v2202_v21 }
  0x83   :  { %v234_v56 = vadd.f32 %v233_v44, %v232_v50  ;;  %v2214_v44 = vpack.c.bf16 %v708_v30, %v707_v29  ;;  %v710_v50 = vld [vmem:[%s2852_s3 + $0x68] sm:$0xff]  ;;  %v247_v53 = vsel %vm50_vm0, %v185_v35, 0.0 }
  0x85   :  { %v236_v7 = vadd.f32 %v235_v54, %v234_v56  ;;  %1596 = vmatprep.subr.bf16.mxu1 %v2214_v44  ;;  %v2226_v56 = vpack.c.bf16 %v710_v50, %v709_v48 }
  0x86   :  { %1604 = vmatpush3.bf16.msra.mxu1 %v2214_v44 }
  0x87   :  { %v238_v20 = vadd.f32 %v237_v63, %v236_v7  ;;  %1597 = vmatprep.subr.bf16.mxu1 %v2226_v56 }
  0x89   :  { %v240_v33 = vadd.f32 %v239_v17, %v238_v20  ;;  %v264_v20 = vlaneseq }
  0x8a   :  { %1605 = vmatpush3.bf16.msra.mxu1 %v2226_v56 }
  0x8b   :  { %v242_v42 = vadd.f32 %v241_v26, %v240_v33  ;;  %v2231_v24 = vshrl.u32 %v264_v20, 7  ;;  %v2236_v26 = vld [vmem:[%s2853_s1] sm:$0xf] }
  0x8d   :  { %v244_v51 = vadd.f32 %v243_v39, %v242_v42  ;;  %v266_v29 = vsub.s32 0, %v2231_v24 }
  0x8f   :  { %v246_v54 = vadd.f32 %v245_v47, %v244_v51  ;;  %v302_v47 = vsub.s32 1, %v2231_v24 }
  0x91   :  { %v248_v59 = vadd.f32 %v247_v53, %v246_v54 }
  0x93   :  { %v249_v60 = vrot.slane %v248_v59, 4 }
  0x95   :  { %v250_v63 = vadd.f32 %v249_v60, %v248_v59 }
  0x97   :  { %v251_v2 = vrot.slane %v250_v63, 2 }
  0x99   :  { %v252_v4 = vadd.f32 %v251_v2, %v250_v63 }
  0x9b   :  { %v253_v7 = vrot.slane %v252_v4, 1 }
  0x9d   :  { %v254_v11 = vadd.f32 %v253_v7, %v252_v4 }
  0x9f   :  { %v255_v15 = vmul.f32 0.00390625, %v254_v11 }
  0xa1   :  { %v256_v17 = vadd.f32 1e-05, %v255_v15 }
  0xa3   :  { %1607 = vrsqrt.f32 %v256_v17 }
  0xad   :  { %v1608_v30 = vpop.eup %1607 }
  0xae   :  { %v258_v33 = vmul.f32 %v1608_v30, %v2236_v26 }
  0xb0   :  { %v259_v35 = vmul.f32 %v258_v33, %v2062_v1  ;;  %v2241_v39 = vrot.slane %v258_v33, %v266_v29 }
  0xb2   :  { %v261_v42 = vrot.slane %v259_v35, 7  ;;  %v268_v50 = vmul.f32 %v2241_v39, %v1841_v5  ;;  %v269_v51 = vmul.f32 %v2241_v39, %v1846_v6  ;;  %v270_v53 = vmul.f32 %v2241_v39, %v1851_v8 }
  0xb3   :  { %v271_v1 = vmul.f32 %v2241_v39, %v1856_v9  ;;  %v272_v5 = vmul.f32 %v2241_v39, %v1865_v12  ;;  %v273_v8 = vmul.f32 %v2241_v39, %v1874_v16  ;;  %v274_v2 = vmul.f32 %v2241_v39, %v1881_v19 }
  0xb4   :  { %v263_v48 = vsub.f32 %v2236_v26, %v261_v42  ;;  %v275_v4 = vmul.f32 %v2241_v39, %v1888_v22  ;;  %v276_v7 = vmul.f32 %v2241_v39, %v1895_v25  ;;  %v278_v11 = vmul.f32 %v2241_v39, %v1909_v31 }
  0xb5   :  { %v280_v15 = vmul.f32 %v2241_v39, %v1923_v37  ;;  %v282_v17 = vmul.f32 %v2241_v39, %v1937_v43  ;;  %v284_v20 = vmul.f32 %v2241_v39, %v1951_v49  ;;  %v286_v29 = vmul.f32 %v2241_v39, %v1965_v55 }
  0xb6   :  { %v2251_v54 = vrot.slane %v263_v48, %v302_v47  ;;  %v288_v30 = vmul.f32 %v2241_v39, %v1979_v61  ;;  %v291_v61 = vmul.f32 %v2241_v39, %v2000_v10  ;;  %v294_v10 = vmul.f32 %v2241_v39, %v2021_v23 }
  0xb7   :  { %v297_v23 = vmul.f32 %v2241_v39, %v2042_v36 }
  0xb8   :  { %v304_v59 = vadd.f32 %v2251_v54, %v268_v50  ;;  %v305_v60 = vadd.f32 %v2251_v54, %v269_v51  ;;  %v306_v63 = vadd.f32 %v2251_v54, %v270_v53  ;;  %v307_v6 = vadd.f32 %v2251_v54, %v271_v1 }
  0xb9   :  { %v308_v9 = vadd.f32 %v2251_v54, %v272_v5  ;;  %v309_v12 = vadd.f32 %v2251_v54, %v273_v8  ;;  %v310_v16 = vadd.f32 %v2251_v54, %v274_v2  ;;  %v311_v19 = vadd.f32 %v2251_v54, %v275_v4 }
  0xba   :  { %1423 = vmatprep.mubr.msk.f32.mxu0 %vm50_vm0, %v304_v59  ;;  %v312_v22 = vadd.f32 %v2251_v54, %v276_v7  ;;  %v324_v33 = vadd.f32 %v2251_v54, %v288_v30  ;;  %v327_v47 = vadd.f32 %v2251_v54, %v291_v61  ;;  %v330_v51 = vadd.f32 %v2251_v54, %v294_v10 }
  0xbb   :  { %1424 = vmatmul.mubr.msk.f32.vlgmr.msra.gmra.mrb[0].mxu0 %vm50_vm0, %v305_v60  ;;  %v333_v59 = vadd.f32 %v2251_v54, %v297_v23 }
  0xbc   :  { %1426 = vmatprep.mubr.msk.f32.mxu0 %vm50_vm0, %v306_v63  ;;  %1562 = vmatpush3.bf16.msra.mxu0 %v2144_v62  ;;  %v277_v62 = vmul.f32 %v2241_v39, %v1902_v28  ;;  %v314_v28 = vadd.f32 %v2251_v54, %v278_v11  ;;  %v342_v63 = vsub.s32 2, %v2231_v24 }
  0xbd   :  { %1564 = vmatprep.subr.bf16.mxu0 %v2153_v13 }
  0xbe   :  { %v313_v25 = vadd.f32 %v2251_v54, %v277_v62 }
  0xbf   :  { %1427 = vmatmul.mubr.msk.f32.gmra.mrb[2].mxu0 %vm50_vm0, %v307_v6 }
  0xc0   :  { %1429 = vmatprep.mubr.msk.f32.mxu0 %vm50_vm0, %v308_v9  ;;  %1566 = vmatpush3.bf16.msra.mxu0 %v2153_v13  ;;  %v279_v13 = vmul.f32 %v2241_v39, %v1916_v34  ;;  %v316_v34 = vadd.f32 %v2251_v54, %v280_v15 }
  0xc1   :  { %1568 = vmatprep.subr.bf16.mxu0 %v2170_v38 }
  0xc2   :  { %v315_v31 = vadd.f32 %v2251_v54, %v279_v13 }
  0xc3   :  { %1430 = vmatmul.mubr.msk.f32.gmra.mrb[4].mxu0 %vm50_vm0, %v309_v12 }
  0xc4   :  { %1432 = vmatprep.mubr.msk.f32.mxu0 %vm50_vm0, %v310_v16  ;;  %1570 = vmatpush3.bf16.msra.mxu0 %v2170_v38  ;;  %v281_v38 = vmul.f32 %v2241_v39, %v1930_v40  ;;  %v318_v40 = vadd.f32 %v2251_v54, %v282_v17 }
  0xc5   :  { %1572 = vmatprep.subr.bf16.mxu0 %v2186_v57 }
  0xc6   :  { %v317_v37 = vadd.f32 %v2251_v54, %v281_v38 }
  0xc7   :  { %1433 = vmatmul.mubr.msk.f32.gmra.mrb[6].mxu0 %vm50_vm0, %v311_v19 }
  0xc8   :  { %1435 = vmatprep.mubr.msk.f32.mxu0 %vm50_vm0, %v312_v22  ;;  %1574 = vmatpush3.bf16.msra.mxu0 %v2186_v57  ;;  %v283_v57 = vmul.f32 %v2241_v39, %v1944_v46  ;;  %v320_v46 = vadd.f32 %v2251_v54, %v284_v20 }
  0xc9   :  { %1576 = vmatprep.subr.bf16.mxu0 %v2202_v21 }
  0xca   :  { %v319_v43 = vadd.f32 %v2251_v54, %v283_v57 }
  0xcb   :  { %1436 = vmatmul.mubr.msk.f32.gmra.mrb[8].mxu0 %vm50_vm0, %v313_v25 }
  0xcc   :  { %1438 = vmatprep.mubr.msk.f32.mxu0 %vm50_vm0, %v314_v28  ;;  %1578 = vmatpush3.bf16.msra.mxu0 %v2202_v21  ;;  %v285_v21 = vmul.f32 %v2241_v39, %v1958_v52  ;;  %v322_v52 = vadd.f32 %v2251_v54, %v286_v29 }
  0xcd   :  { %1580 = vmatprep.subr.bf16.mxu0 %v2214_v44 }
  0xce   :  { %v321_v49 = vadd.f32 %v2251_v54, %v285_v21 }
  0xcf   :  { %1439 = vmatmul.mubr.msk.f32.gmra.mrb[10].mxu0 %vm50_vm0, %v315_v31 }
  0xd0   :  { %1441 = vmatprep.mubr.msk.f32.mxu0 %vm50_vm0, %v316_v34  ;;  %1582 = vmatpush3.bf16.msra.mxu0 %v2214_v44  ;;  %v287_v44 = vmul.f32 %v2241_v39, %v1972_v58  ;;  %v290_v58 = vmul.f32 %v2241_v39, %v1993_v3  ;;  %v293_v3 = vmul.f32 %v2241_v39, %v2014_v18 }
  0xd1   :  { %1584 = vmatprep.subr.bf16.mxu0 %v2226_v56  ;;  %v296_v18 = vmul.f32 %v2241_v39, %v2035_v32  ;;  %v299_v32 = vmul.f32 %v2241_v39, %v2056_v45  ;;  %v712_v45 = vld [vmem:[%s2852_s3 + $0x78] sm:$0xff] }
  0xd2   :  { %v323_v55 = vadd.f32 %v2251_v54, %v287_v44  ;;  %v326_v42 = vadd.f32 %v2251_v54, %v290_v58  ;;  %v329_v50 = vadd.f32 %v2251_v54, %v293_v3 }
  0xd3   :  { %1442 = vmatmul.mubr.msk.f32.gmra.mrb[12].mxu0 %vm50_vm0, %v317_v37  ;;  %v332_v1 = vadd.f32 %v2251_v54, %v296_v18  ;;  %v335_v36 = vadd.f32 %v2251_v54, %v299_v32 }
  0xd4   :  { %1444 = vmatprep.mubr.msk.f32.mxu0 %vm50_vm0, %v318_v40  ;;  %1586 = vmatpush3.bf16.msra.mxu0 %v2226_v56  ;;  %v289_v56 = vmul.f32 %v2241_v39, %v1986_v0  ;;  %v292_v0 = vmul.f32 %v2241_v39, %v2007_v14  ;;  %v295_v14 = vmul.f32 %v2241_v39, %v2028_v27 }
  0xd5   :  { %v298_v27 = vmul.f32 %v2241_v39, %v2049_v41  ;;  %v711_v41 = vld [vmem:[%s2852_s3 + $0x70] sm:$0xff] }
  0xd6   :  { %v325_v35 = vadd.f32 %v2251_v54, %v289_v56  ;;  %v328_v48 = vadd.f32 %v2251_v54, %v292_v0  ;;  %v331_v53 = vadd.f32 %v2251_v54, %v295_v14  ;;  %v1587_v39 = vpack.c.bf16 %v712_v45, %v711_v41 }
  0xd7   :  { %1445 = vmatmul.mubr.msk.f32.gmra.mrb[14].mxu0 %vm50_vm0, %v319_v43  ;;  %v334_v60 = vadd.f32 %v2251_v54, %v298_v27  ;;  %v2396_v54 = vrot.slane %v2236_v26, %v342_v63 }
  0xd8   :  { %1447 = vmatprep.mubr.msk.f32.mxu0 %vm50_vm0, %v320_v46  ;;  %1588 = vmatprep.subr.bf16.mxu0 %v1587_v39 }
  0xd9   :  { %1598 = vmatprep.subr.bf16.mxu1 %v1587_v39  ;;  %1590 = vmatpush3.bf16.msra.mxu0 %v1587_v39 }
  0xda   :  { %1606 = vmatpush3.bf16.msra.mxu1 %v1587_v39 }
  0xdb   :  { %1448 = vmatmul.mubr.msk.f32.gmra.mrb[16].mxu0 %vm50_vm0, %v321_v49 }
  0xdc   :  { %1450 = vmatprep.mubr.msk.f32.mxu0 %vm50_vm0, %v322_v52 }
  0xdf   :  { %1451 = vmatmul.mubr.msk.f32.gmra.mrb[18].mxu0 %vm50_vm0, %v323_v55 }
  0xe0   :  { %1453 = vmatprep.mubr.msk.f32.mxu0 %vm50_vm0, %v324_v33 }
  0xe3   :  { %1454 = vmatmul.mubr.msk.f32.gmra.mrb[20].mxu0 %vm50_vm0, %v325_v35 }
  0xe4   :  { %1456 = vmatprep.mubr.msk.f32.mxu0 %vm50_vm0, %v326_v42 }
  0xe7   :  { %1457 = vmatmul.mubr.msk.f32.gmra.mrb[22].mxu0 %vm50_vm0, %v327_v47 }
  0xe8   :  { %1459 = vmatprep.mubr.msk.f32.mxu0 %vm50_vm0, %v328_v48 }
  0xeb   :  { %1460 = vmatmul.mubr.msk.f32.gmra.mrb[24].mxu0 %vm50_vm0, %v329_v50 }
  0xec   :  { %1462 = vmatprep.mubr.msk.f32.mxu0 %vm50_vm0, %v330_v51 }
  0xef   :  { %1463 = vmatmul.mubr.msk.f32.gmra.mrb[26].mxu0 %vm50_vm0, %v331_v53 }
  0xf0   :  { %1465 = vmatprep.mubr.msk.f32.mxu0 %vm50_vm0, %v332_v1 }
  0xf3   :  { %1466 = vmatmul.mubr.msk.f32.gmra.mrb[28].mxu0 %vm50_vm0, %v333_v59 }
  0xf4   :  { %1468 = vmatprep.mubr.msk.f32.mxu0 %vm50_vm0, %v334_v60 }
  0xf7   :  { %1469 = vmatmul.mubr.msk.f32.gmra.mrb[30].mxu0 %vm50_vm0, %v335_v36 }
 0x18e   :  { %v1425_v5 = vpop.f32.mrb[0].mxu0 }
 0x18f   :  { %v512_v6 = vadd.f32 %v1425_v5, %v2396_v54  ;;  %v506_v8 = vpop.f32.mrb[1].mxu0 }
 0x190   :  { %v507_v9 = vadd.f32 %v506_v8, %v2396_v54 }
 0x192   :  { %1609 = vtanh.f32 %v507_v9  ;;  %v1428_v2 = vpop.f32.mrb[2].mxu0 }
 0x193   :  { %1611 = vtanh.f32 %v512_v6  ;;  %v522_v12 = vadd.f32 %v1428_v2, %v2396_v54  ;;  %v516_v4 = vpop.f32.mrb[3].mxu0 }
 0x194   :  { %v517_v16 = vadd.f32 %v516_v4, %v2396_v54 }
 0x196   :  { %1613 = vtanh.f32 %v517_v16  ;;  %v1431_v7 = vpop.f32.mrb[4].mxu0 }
 0x197   :  { %1615 = vtanh.f32 %v522_v12  ;;  %v532_v19 = vadd.f32 %v1431_v7, %v2396_v54  ;;  %v526_v62 = vpop.f32.mrb[5].mxu0 }
 0x198   :  { %v527_v22 = vadd.f32 %v526_v62, %v2396_v54 }
 0x199   :  { %1617 = vtanh.f32 %v532_v19 }
 0x19a   :  { %1619 = vtanh.f32 %v527_v22  ;;  %v1434_v11 = vpop.f32.mrb[6].mxu0 }
 0x19b   :  { %v542_v25 = vadd.f32 %v1434_v11, %v2396_v54  ;;  %v536_v13 = vpop.f32.mrb[7].mxu0 }
 0x19c   :  { %v1610_v28 = vpop.eup %1609  ;;  %v537_v15 = vadd.f32 %v536_v13, %v2396_v54 }
 0x19d   :  { %v1612_v31 = vpop.eup %1611  ;;  %1621 = vtanh.f32 %v542_v25  ;;  %1503 = vmatprep.mubr.f32.mxu0 %v1610_v28 }
 0x19e   :  { %1623 = vtanh.f32 %v537_v15  ;;  %v1437_v38 = vpop.f32.mrb[8].mxu0  ;;  %1504 = vmatmul.mubr.f32.vlgmr.msra.gmra.mrb[32].mxu0 %v1612_v31 }
 0x19f   :  { %v552_v34 = vadd.f32 %v1437_v38, %v2396_v54  ;;  %v546_v17 = vpop.f32.mrb[9].mxu0 }
 0x1a0   :  { %v1614_v37 = vpop.eup %1613  ;;  %v547_v57 = vadd.f32 %v546_v17, %v2396_v54 }
 0x1a1   :  { %v1616_v40 = vpop.eup %1615  ;;  %1625 = vtanh.f32 %v552_v34  ;;  %1506 = vmatprep.mubr.f32.mxu0 %v1614_v37 }
 0x1a2   :  { %1627 = vtanh.f32 %v547_v57  ;;  %v1440_v20 = vpop.f32.mrb[10].mxu0  ;;  %1507 = vmatmul.mubr.f32.gmra.mrb[34].mxu0 %v1616_v40 }
 0x1a3   :  { %v1618_v43 = vpop.eup %1617  ;;  %v562_v21 = vadd.f32 %v1440_v20, %v2396_v54  ;;  %v556_v46 = vpop.f32.mrb[11].mxu0 }
 0x1a4   :  { %v1620_v29 = vpop.eup %1619  ;;  %v557_v49 = vadd.f32 %v556_v46, %v2396_v54 }
 0x1a5   :  { %1629 = vtanh.f32 %v562_v21  ;;  %1509 = vmatprep.mubr.f32.mxu0 %v1620_v29 }
 0x1a6   :  { %1631 = vtanh.f32 %v557_v49  ;;  %v1443_v44 = vpop.f32.mrb[12].mxu0  ;;  %1510 = vmatmul.mubr.f32.gmra.mrb[36].mxu0 %v1618_v43 }
 0x1a7   :  { %v1622_v52 = vpop.eup %1621  ;;  %v572_v30 = vadd.f32 %v1443_v44, %v2396_v54  ;;  %v566_v55 = vpop.f32.mrb[13].mxu0 }
 0x1a8   :  { %v1624_v56 = vpop.eup %1623  ;;  %v567_v33 = vadd.f32 %v566_v55, %v2396_v54 }
 0x1a9   :  { %1633 = vtanh.f32 %v572_v30  ;;  %1512 = vmatprep.mubr.f32.mxu1 %v1624_v56 }
 0x1aa   :  { %1635 = vtanh.f32 %v567_v33  ;;  %v1446_v58 = vpop.f32.mrb[14].mxu0  ;;  %1513 = vmatmul.mubr.f32.vlgmr.msra.gmra.mrb[0].mxu1 %v1622_v52  ;;  %v715_v33 = vsub.s32 3, %v2231_v24 }
 0x1ab   :  { %v1626_v35 = vpop.eup %1625  ;;  %v582_v61 = vadd.f32 %v1446_v58, %v2396_v54  ;;  %v576_v42 = vpop.f32.mrb[15].mxu0 }
 0x1ac   :  { %v1628_v0 = vpop.eup %1627  ;;  %v577_v47 = vadd.f32 %v576_v42, %v2396_v54 }
 0x1ad   :  { %1637 = vtanh.f32 %v582_v61  ;;  %1515 = vmatprep.mubr.f32.mxu1 %v1628_v0 }
 0x1ae   :  { %1639 = vtanh.f32 %v577_v47  ;;  %v1449_v3 = vpop.f32.mrb[16].mxu0  ;;  %1516 = vmatmul.mubr.f32.gmra.mrb[2].mxu1 %v1626_v35 }
 0x1af   :  { %v1630_v48 = vpop.eup %1629  ;;  %v592_v10 = vadd.f32 %v1449_v3, %v2396_v54  ;;  %v586_v50 = vpop.f32.mrb[17].mxu0 }
 0x1b0   :  { %v1632_v14 = vpop.eup %1631  ;;  %v587_v51 = vadd.f32 %v586_v50, %v2396_v54 }
 0x1b1   :  { %1641 = vtanh.f32 %v592_v10  ;;  %1518 = vmatprep.mubr.f32.mxu1 %v1632_v14 }
 0x1b2   :  { %1643 = vtanh.f32 %v587_v51  ;;  %v1452_v18 = vpop.f32.mrb[18].mxu0  ;;  %1519 = vmatmul.mubr.f32.gmra.mrb[4].mxu1 %v1630_v48 }
 0x1b3   :  { %v1634_v53 = vpop.eup %1633  ;;  %v602_v23 = vadd.f32 %v1452_v18, %v2396_v54  ;;  %v596_v1 = vpop.f32.mrb[19].mxu0 }
 0x1b4   :  { %v1636_v27 = vpop.eup %1635  ;;  %v597_v59 = vadd.f32 %v596_v1, %v2396_v54 }
 0x1b5   :  { %1645 = vtanh.f32 %v602_v23  ;;  %1521 = vmatprep.mubr.f32.mxu1 %v1636_v27 }
 0x1b6   :  { %1647 = vtanh.f32 %v597_v59  ;;  %v1455_v32 = vpop.f32.mrb[20].mxu0  ;;  %1522 = vmatmul.mubr.f32.gmra.mrb[6].mxu1 %v1634_v53 }
 0x1b7   :  { %v1638_v60 = vpop.eup %1637  ;;  %v612_v36 = vadd.f32 %v1455_v32, %v2396_v54  ;;  %v606_v41 = vpop.f32.mrb[21].mxu0 }
 0x1b8   :  { %v1640_v45 = vpop.eup %1639  ;;  %v607_v39 = vadd.f32 %v606_v41, %v2396_v54 }
 0x1b9   :  { %1649 = vtanh.f32 %v612_v36  ;;  %1524 = vmatprep.mubr.f32.mxu1 %v1640_v45 }
 0x1ba   :  { %1651 = vtanh.f32 %v607_v39  ;;  %v1458_v63 = vpop.f32.mrb[22].mxu0  ;;  %1525 = vmatmul.mubr.f32.gmra.mrb[8].mxu1 %v1638_v60 }
 0x1bb   :  { %v1642_v5 = vpop.eup %1641  ;;  %v622_v6 = vadd.f32 %v1458_v63, %v2396_v54  ;;  %v616_v8 = vpop.f32.mrb[23].mxu0 }
 0x1bc   :  { %v1644_v9 = vpop.eup %1643  ;;  %v617_v2 = vadd.f32 %v616_v8, %v2396_v54 }
 0x1bd   :  { %1653 = vtanh.f32 %v622_v6  ;;  %1527 = vmatprep.mubr.f32.mxu1 %v1644_v9 }
 0x1be   :  { %1655 = vtanh.f32 %v617_v2  ;;  %v1461_v12 = vpop.f32.mrb[24].mxu0  ;;  %1528 = vmatmul.mubr.f32.gmra.mrb[10].mxu1 %v1642_v5 }
 0x1bf   :  { %v1646_v4 = vpop.eup %1645  ;;  %v632_v16 = vadd.f32 %v1461_v12, %v2396_v54  ;;  %v626_v7 = vpop.f32.mrb[25].mxu0 }
 0x1c0   :  { %v1648_v19 = vpop.eup %1647  ;;  %v627_v62 = vadd.f32 %v626_v7, %v2396_v54 }
 0x1c1   :  { %1657 = vtanh.f32 %v632_v16  ;;  %1530 = vmatprep.mubr.f32.mxu1 %v1648_v19 }
 0x1c2   :  { %1659 = vtanh.f32 %v627_v62  ;;  %v1464_v22 = vpop.f32.mrb[26].mxu0  ;;  %1531 = vmatmul.mubr.f32.gmra.mrb[12].mxu1 %v1646_v4 }
 0x1c3   :  { %v1650_v11 = vpop.eup %1649  ;;  %v642_v25 = vadd.f32 %v1464_v22, %v2396_v54  ;;  %v636_v13 = vpop.f32.mrb[27].mxu0 }
 0x1c4   :  { %v1652_v28 = vpop.eup %1651  ;;  %v637_v15 = vadd.f32 %v636_v13, %v2396_v54 }
 0x1c5   :  { %1661 = vtanh.f32 %v642_v25  ;;  %1533 = vmatprep.mubr.f32.mxu1 %v1652_v28 }
 0x1c6   :  { %1663 = vtanh.f32 %v637_v15  ;;  %v1467_v31 = vpop.f32.mrb[28].mxu0  ;;  %1534 = vmatmul.mubr.f32.gmra.mrb[14].mxu1 %v1650_v11 }
 0x1c7   :  { %v1654_v38 = vpop.eup %1653  ;;  %v652_v34 = vadd.f32 %v1467_v31, %v2396_v54  ;;  %v646_v17 = vpop.f32.mrb[29].mxu0 }
 0x1c8   :  { %v1656_v37 = vpop.eup %1655  ;;  %v647_v57 = vadd.f32 %v646_v17, %v2396_v54 }
 0x1c9   :  { %1665 = vtanh.f32 %v652_v34  ;;  %1536 = vmatprep.mubr.f32.mxu1 %v1656_v37 }
 0x1ca   :  { %1667 = vtanh.f32 %v647_v57  ;;  %v1470_v40 = vpop.f32.mrb[30].mxu0  ;;  %1537 = vmatmul.mubr.f32.gmra.mrb[16].mxu1 %v1654_v38 }
 0x1cb   :  { %v1658_v20 = vpop.eup %1657  ;;  %v662_v43 = vadd.f32 %v1470_v40, %v2396_v54  ;;  %v656_v21 = vpop.f32.mrb[31].mxu0 }
 0x1cc   :  { %v1660_v46 = vpop.eup %1659  ;;  %v657_v29 = vadd.f32 %v656_v21, %v2396_v54  ;;  %v2432_v54 = vrot.slane %v2236_v26, %v715_v33 }
 0x1cd   :  { %1669 = vtanh.f32 %v662_v43  ;;  %1539 = vmatprep.mubr.f32.mxu1 %v1660_v46 }
 0x1ce   :  { %1671 = vtanh.f32 %v657_v29  ;;  %1540 = vmatmul.mubr.f32.gmra.mrb[18].mxu1 %v1658_v20 }
 0x1cf   :  { %v1662_v49 = vpop.eup %1661 }
 0x1d0   :  { %v1664_v44 = vpop.eup %1663 }
 0x1d1   :  { %1542 = vmatprep.mubr.f32.mxu1 %v1664_v44 }
 0x1d2   :  { %1543 = vmatmul.mubr.f32.gmra.mrb[20].mxu1 %v1662_v49 }
 0x1d3   :  { %v1666_v52 = vpop.eup %1665 }
 0x1d4   :  { %v1668_v30 = vpop.eup %1667 }
 0x1d5   :  { %1545 = vmatprep.mubr.f32.mxu1 %v1668_v30 }
 0x1d6   :  { %1546 = vmatmul.mubr.f32.gmra.mrb[22].mxu1 %v1666_v52 }
 0x1d7   :  { %v1670_v55 = vpop.eup %1669 }
 0x1d8   :  { %v1672_v56 = vpop.eup %1671 }
 0x1d9   :  { %1548 = vmatprep.mubr.f32.mxu1 %v1672_v56 }
 0x1da   :  { %1549 = vmatmul.mubr.f32.gmra.mrb[24].mxu1 %v1670_v55 }
 0x271   :  { %v1505_v58 = vpop.f32.mrb[32].mxu0 }
 0x272   :  { %v2435_v35 = vadd.f32 %v1505_v58, %v2432_v54  ;;  %v783_v61 = vpop.f32.mrb[33].mxu0 }
 0x273   :  { %v2438_v42 = vadd.f32 %v783_v61, %v2432_v54 }
 0x274   :  { %944 = vmax.xlane.f32.xlu0 %v2435_v35 }
 0x275   :  { %v1508_v0 = vpop.f32.mrb[34].mxu0 }
 0x276   :  { %v2442_v47 = vadd.f32 %v1508_v0, %v2432_v54  ;;  %v793_v3 = vpop.f32.mrb[35].mxu0 }
 0x277   :  { %v2445_v24 = vadd.f32 %v793_v3, %v2432_v54 }
 0x278   :  { %948 = vmax.xlane.f32.xlu1 %v2442_v47  ;;  %942 = vmax.xlane.f32.xlu0 %v2438_v42 }
 0x279   :  { %v1511_v26 = vpop.f32.mrb[36].mxu0 }
 0x27a   :  { %v2450_v48 = vadd.f32 %v1511_v26, %v2432_v54  ;;  %v803_v10 = vpop.f32.mrb[37].mxu0 }
 0x27b   :  { %v2453_v50 = vadd.f32 %v803_v10, %v2432_v54 }
 0x27c   :  { %946 = vmax.xlane.f32.xlu1 %v2445_v24 }
 0x27d   :  { %v1514_v14 = vpop.f32.mrb[0].mxu1  ;;  %950 = vmax.xlane.f32.xlu0 %v2453_v50 }
 0x27e   :  { %v2458_v51 = vadd.f32 %v1514_v14, %v2432_v54  ;;  %v813_v18 = vpop.f32.mrb[1].mxu1 }
 0x27f   :  { %v2461_v53 = vadd.f32 %v813_v18, %v2432_v54 }
 0x280   :  { %952 = vmax.xlane.f32.xlu1 %v2450_v48 }
 0x281   :  { %v1517_v23 = vpop.f32.mrb[2].mxu1  ;;  %954 = vmax.xlane.f32.xlu0 %v2461_v53 }
 0x282   :  { %v2466_v1 = vadd.f32 %v1517_v23, %v2432_v54  ;;  %v823_v27 = vpop.f32.mrb[3].mxu1 }
 0x283   :  { %v2469_v59 = vadd.f32 %v823_v27, %v2432_v54 }
 0x284   :  { %956 = vmax.xlane.f32.xlu1 %v2458_v51 }
 0x285   :  { %v1520_v32 = vpop.f32.mrb[4].mxu1  ;;  %958 = vmax.xlane.f32.xlu0 %v2469_v59 }
 0x286   :  { %v2474_v60 = vadd.f32 %v1520_v32, %v2432_v54  ;;  %v833_v36 = vpop.f32.mrb[5].mxu1 }
 0x287   :  { %v2477_v41 = vadd.f32 %v833_v36, %v2432_v54 }
 0x288   :  { %960 = vmax.xlane.f32.xlu1 %v2466_v1 }
 0x289   :  { %v1523_v45 = vpop.f32.mrb[6].mxu1  ;;  %962 = vmax.xlane.f32.xlu0 %v2477_v41 }
 0x28a   :  { %v2482_v39 = vadd.f32 %v1523_v45, %v2432_v54  ;;  %v843_v63 = vpop.f32.mrb[7].mxu1 }
 0x28b   :  { %v2485_v5 = vadd.f32 %v843_v63, %v2432_v54 }
 0x28c   :  { %964 = vmax.xlane.f32.xlu1 %v2474_v60 }
 0x28d   :  { %v1526_v6 = vpop.f32.mrb[8].mxu1  ;;  %966 = vmax.xlane.f32.xlu0 %v2485_v5 }
 0x28e   :  { %v2490_v8 = vadd.f32 %v1526_v6, %v2432_v54  ;;  %v853_v9 = vpop.f32.mrb[9].mxu1 }
 0x28f   :  { %v2493_v2 = vadd.f32 %v853_v9, %v2432_v54 }
 0x290   :  { %968 = vmax.xlane.f32.xlu1 %v2482_v39 }
 0x291   :  { %v1529_v12 = vpop.f32.mrb[10].mxu1  ;;  %970 = vmax.xlane.f32.xlu0 %v2493_v2 }
 0x292   :  { %v2498_v4 = vadd.f32 %v1529_v12, %v2432_v54  ;;  %v863_v16 = vpop.f32.mrb[11].mxu1 }
 0x293   :  { %v2501_v7 = vadd.f32 %v863_v16, %v2432_v54 }
 0x294   :  { %972 = vmax.xlane.f32.xlu1 %v2490_v8 }
 0x295   :  { %v1532_v19 = vpop.f32.mrb[12].mxu1  ;;  %974 = vmax.xlane.f32.xlu0 %v2501_v7 }
 0x296   :  { %v2506_v62 = vadd.f32 %v1532_v19, %v2432_v54  ;;  %v873_v22 = vpop.f32.mrb[13].mxu1 }
 0x297   :  { %v2509_v11 = vadd.f32 %v873_v22, %v2432_v54 }
 0x298   :  { %976 = vmax.xlane.f32.xlu1 %v2498_v4 }
 0x299   :  { %v1535_v25 = vpop.f32.mrb[14].mxu1  ;;  %978 = vmax.xlane.f32.xlu0 %v2509_v11 }
 0x29a   :  { %v2514_v13 = vadd.f32 %v1535_v25, %v2432_v54  ;;  %v883_v28 = vpop.f32.mrb[15].mxu1 }
 0x29b   :  { %v2517_v15 = vadd.f32 %v883_v28, %v2432_v54 }
 0x29c   :  { %980 = vmax.xlane.f32.xlu1 %v2506_v62 }
 0x29d   :  { %v1538_v31 = vpop.f32.mrb[16].mxu1  ;;  %982 = vmax.xlane.f32.xlu0 %v2517_v15 }
 0x29e   :  { %v2522_v38 = vadd.f32 %v1538_v31, %v2432_v54  ;;  %v893_v34 = vpop.f32.mrb[17].mxu1 }
 0x29f   :  { %v2525_v17 = vadd.f32 %v893_v34, %v2432_v54 }
 0x2a0   :  { %984 = vmax.xlane.f32.xlu1 %v2514_v13 }
 0x2a1   :  { %v1541_v37 = vpop.f32.mrb[18].mxu1  ;;  %986 = vmax.xlane.f32.xlu0 %v2525_v17 }
 0x2a2   :  { %v2530_v57 = vadd.f32 %v1541_v37, %v2432_v54  ;;  %v903_v40 = vpop.f32.mrb[19].mxu1 }
 0x2a3   :  { %v2533_v20 = vadd.f32 %v903_v40, %v2432_v54 }
 0x2a4   :  { %988 = vmax.xlane.f32.xlu1 %v2522_v38 }
 0x2a5   :  { %v1544_v43 = vpop.f32.mrb[20].mxu1  ;;  %990 = vmax.xlane.f32.xlu0 %v2533_v20 }
 0x2a6   :  { %v2538_v21 = vadd.f32 %v1544_v43, %v2432_v54  ;;  %v913_v46 = vpop.f32.mrb[21].mxu1 }
 0x2a7   :  { %v2541_v29 = vadd.f32 %v913_v46, %v2432_v54 }
 0x2a8   :  { %992 = vmax.xlane.f32.xlu1 %v2530_v57 }
 0x2a9   :  { %v1547_v49 = vpop.f32.mrb[22].mxu1  ;;  %994 = vmax.xlane.f32.xlu0 %v2541_v29 }
 0x2aa   :  { %v2546_v44 = vadd.f32 %v1547_v49, %v2432_v54  ;;  %v923_v52 = vpop.f32.mrb[23].mxu1 }
 0x2ab   :  { %v2549_v30 = vadd.f32 %v923_v52, %v2432_v54 }
 0x2ac   :  { %996 = vmax.xlane.f32.xlu1 %v2538_v21 }
 0x2ad   :  { %v1550_v55 = vpop.f32.mrb[24].mxu1  ;;  %998 = vmax.xlane.f32.xlu0 %v2549_v30 }
 0x2ae   :  { %v2554_v56 = vadd.f32 %v1550_v55, %v2432_v54  ;;  %v933_v33 = vpop.f32.mrb[25].mxu1 }
 0x2af   :  { %v2557_v58 = vadd.f32 %v933_v33, %v2432_v54 }
 0x2b0   :  { %1000 = vmax.xlane.f32.xlu1 %v2546_v44 }
 0x2b1   :  { %1002 = vmax.xlane.f32.xlu0 %v2557_v58 }
 0x2b4   :  { %1004 = vmax.xlane.f32.xlu1 %v2554_v56 }
 0x301   :  { %v945_v61 = vpop.xlane.xlu0 %944 }
 0x302   :  { %v2563_v0 = vsub.f32 %v2435_v35, %v945_v61 }
 0x304   :  { %v1040_v3 = vmul.f32 1.442695, %v2563_v0 }
 0x305   :  { %v949_v26 = vpop.xlane.xlu1 %948  ;;  %v943_v10 = vpop.xlane.xlu0 %942 }
 0x306   :  { %1673 = vpow2.f32 %v1040_v3  ;;  %v2567_v14 = vsub.f32 %v2442_v47, %v949_v26  ;;  %v2570_v54 = vsub.f32 %v2438_v42, %v943_v10 }
 0x308   :  { %v1044_v18 = vmul.f32 1.442695, %v2567_v14  ;;  %v1038_v23 = vmul.f32 1.442695, %v2570_v54 }
 0x309   :  { %v947_v27 = vpop.xlane.xlu1 %946 }
 0x30a   :  { %1675 = vpow2.f32 %v1044_v18  ;;  %v2575_v35 = vsub.f32 %v2445_v24, %v947_v27  ;;  %v951_v32 = vpop.xlane.xlu0 %950 }
 0x30b   :  { %1677 = vpow2.f32 %v1038_v23  ;;  %v2578_v36 = vsub.f32 %v2453_v50, %v951_v32 }
 0x30c   :  { %v1042_v47 = vmul.f32 1.442695, %v2575_v35 }
 0x30d   :  { %v953_v45 = vpop.xlane.xlu1 %952  ;;  %v1046_v6 = vmul.f32 1.442695, %v2578_v36 }
 0x30e   :  { %1679 = vpow2.f32 %v1042_v47  ;;  %v2582_v42 = vsub.f32 %v2450_v48, %v953_v45  ;;  %v955_v63 = vpop.xlane.xlu0 %954 }
 0x30f   :  { %v2586_v9 = vsub.f32 %v2461_v53, %v955_v63 }
 0x310   :  { %v1674_v24 = vpop.eup %1673  ;;  %v1048_v12 = vmul.f32 1.442695, %v2582_v42 }
 0x311   :  { %1104 = vadd.xlane.f32.xlu1 %v1674_v24  ;;  %v957_v16 = vpop.xlane.xlu1 %956  ;;  %v1050_v48 = vmul.f32 1.442695, %v2586_v9 }
 0x312   :  { %1681 = vpow2.f32 %v1048_v12  ;;  %v2590_v50 = vsub.f32 %v2458_v51, %v957_v16  ;;  %v959_v19 = vpop.xlane.xlu0 %958 }
 0x313   :  { %1683 = vpow2.f32 %v1046_v6  ;;  %v2594_v22 = vsub.f32 %v2469_v59, %v959_v19 }
 0x314   :  { %v1676_v25 = vpop.eup %1675  ;;  %v1052_v53 = vmul.f32 1.442695, %v2590_v50 }
 0x315   :  { %v1678_v28 = vpop.eup %1677  ;;  %1108 = vadd.xlane.f32.xlu1 %v1676_v25  ;;  %v961_v31 = vpop.xlane.xlu1 %960  ;;  %v1054_v37 = vmul.f32 1.442695, %v2594_v22 }
 0x316   :  { %1685 = vpow2.f32 %v1052_v53  ;;  %v2598_v34 = vsub.f32 %v2466_v1, %v961_v31  ;;  %1102 = vadd.xlane.f32.xlu0 %v1678_v28  ;;  %v963_v51 = vpop.xlane.xlu0 %962 }
 0x317   :  { %1687 = vpow2.f32 %v1050_v48  ;;  %v2602_v40 = vsub.f32 %v2477_v41, %v963_v51 }
 0x318   :  { %v1680_v59 = vpop.eup %1679  ;;  %v1056_v43 = vmul.f32 1.442695, %v2598_v34 }
 0x319   :  { %v965_v46 = vpop.xlane.xlu1 %964  ;;  %v1058_v1 = vmul.f32 1.442695, %v2602_v40 }
 0x31a   :  { %1689 = vpow2.f32 %v1056_v43  ;;  %v2606_v49 = vsub.f32 %v2474_v60, %v965_v46  ;;  %1106 = vadd.xlane.f32.xlu0 %v1680_v59  ;;  %v967_v52 = vpop.xlane.xlu0 %966 }
 0x31b   :  { %1691 = vpow2.f32 %v1054_v37  ;;  %v2610_v55 = vsub.f32 %v2485_v5, %v967_v52 }
 0x31c   :  { %v1682_v33 = vpop.eup %1681  ;;  %v1060_v41 = vmul.f32 1.442695, %v2606_v49 }
 0x31d   :  { %v1684_v61 = vpop.eup %1683  ;;  %1112 = vadd.xlane.f32.xlu1 %v1682_v33  ;;  %v969_v3 = vpop.xlane.xlu1 %968  ;;  %v1062_v10 = vmul.f32 1.442695, %v2610_v55 }
 0x31e   :  { %1693 = vpow2.f32 %v1060_v41  ;;  %v2614_v26 = vsub.f32 %v2482_v39, %v969_v3  ;;  %1110 = vadd.xlane.f32.xlu0 %v1684_v61  ;;  %v971_v60 = vpop.xlane.xlu0 %970 }
 0x31f   :  { %1695 = vpow2.f32 %v1058_v1  ;;  %v2618_v18 = vsub.f32 %v2493_v2, %v971_v60 }
 0x320   :  { %v1686_v5 = vpop.eup %1685  ;;  %v1064_v23 = vmul.f32 1.442695, %v2614_v26 }
 0x321   :  { %v1688_v27 = vpop.eup %1687  ;;  %1116 = vadd.xlane.f32.xlu1 %v1686_v5  ;;  %v973_v32 = vpop.xlane.xlu1 %972  ;;  %v1066_v45 = vmul.f32 1.442695, %v2618_v18 }
 0x322   :  { %1697 = vpow2.f32 %v1064_v23  ;;  %v2622_v47 = vsub.f32 %v2490_v8, %v973_v32  ;;  %1114 = vadd.xlane.f32.xlu0 %v1688_v27  ;;  %v975_v39 = vpop.xlane.xlu0 %974 }
 0x323   :  { %1699 = vpow2.f32 %v1062_v10  ;;  %v2626_v63 = vsub.f32 %v2501_v7, %v975_v39 }
 0x324   :  { %v1690_v2 = vpop.eup %1689  ;;  %v1068_v6 = vmul.f32 1.442695, %v2622_v47 }
 0x325   :  { %v1692_v24 = vpop.eup %1691  ;;  %1120 = vadd.xlane.f32.xlu1 %v1690_v2  ;;  %v977_v12 = vpop.xlane.xlu1 %976  ;;  %v1070_v19 = vmul.f32 1.442695, %v2626_v63 }
 0x326   :  { %1701 = vpow2.f32 %v1068_v6  ;;  %v2630_v16 = vsub.f32 %v2498_v4, %v977_v12  ;;  %1118 = vadd.xlane.f32.xlu0 %v1692_v24  ;;  %v979_v8 = vpop.xlane.xlu0 %978 }
 0x327   :  { %1703 = vpow2.f32 %v1066_v45  ;;  %v2634_v48 = vsub.f32 %v2509_v11, %v979_v8 }
 0x328   :  { %v1694_v7 = vpop.eup %1693  ;;  %v1072_v25 = vmul.f32 1.442695, %v2630_v16 }
 0x329   :  { %v1696_v53 = vpop.eup %1695  ;;  %1124 = vadd.xlane.f32.xlu1 %v1694_v7  ;;  %v981_v28 = vpop.xlane.xlu1 %980  ;;  %v1074_v51 = vmul.f32 1.442695, %v2634_v48 }
 0x32a   :  { %1705 = vpow2.f32 %v1072_v25  ;;  %v2638_v31 = vsub.f32 %v2506_v62, %v981_v28  ;;  %1122 = vadd.xlane.f32.xlu0 %v1696_v53  ;;  %v983_v4 = vpop.xlane.xlu0 %982 }
 0x32b   :  { %1707 = vpow2.f32 %v1070_v19  ;;  %v2642_v37 = vsub.f32 %v2517_v15, %v983_v4 }
 0x32c   :  { %v1698_v11 = vpop.eup %1697  ;;  %v1076_v59 = vmul.f32 1.442695, %v2638_v31 }
 0x32d   :  { %v1700_v43 = vpop.eup %1699  ;;  %1128 = vadd.xlane.f32.xlu1 %v1698_v11  ;;  %v985_v46 = vpop.xlane.xlu1 %984  ;;  %v1078_v1 = vmul.f32 1.442695, %v2642_v37 }
 0x32e   :  { %1709 = vpow2.f32 %v1076_v59  ;;  %v2646_v52 = vsub.f32 %v2514_v13, %v985_v46  ;;  %1126 = vadd.xlane.f32.xlu0 %v1700_v43  ;;  %v987_v62 = vpop.xlane.xlu0 %986 }
 0x32f   :  { %1711 = vpow2.f32 %v1074_v51  ;;  %v2650_v33 = vsub.f32 %v2525_v17, %v987_v62 }
 0x330   :  { %v1702_v15 = vpop.eup %1701  ;;  %v1080_v41 = vmul.f32 1.442695, %v2646_v52 }
 0x331   :  { %v1704_v61 = vpop.eup %1703  ;;  %1132 = vadd.xlane.f32.xlu1 %v1702_v15  ;;  %v989_v3 = vpop.xlane.xlu1 %988  ;;  %v1082_v10 = vmul.f32 1.442695, %v2650_v33 }
 0x332   :  { %1713 = vpow2.f32 %v1080_v41  ;;  %v2654_v60 = vsub.f32 %v2522_v38, %v989_v3  ;;  %1130 = vadd.xlane.f32.xlu0 %v1704_v61  ;;  %v991_v13 = vpop.xlane.xlu0 %990 }
 0x333   :  { %1715 = vpow2.f32 %v1078_v1  ;;  %v2658_v5 = vsub.f32 %v2533_v20, %v991_v13 }
 0x334   :  { %v1706_v17 = vpop.eup %1705  ;;  %v1084_v23 = vmul.f32 1.442695, %v2654_v60 }
 0x335   :  { %v1708_v27 = vpop.eup %1707  ;;  %1136 = vadd.xlane.f32.xlu1 %v1706_v17  ;;  %v993_v32 = vpop.xlane.xlu1 %992  ;;  %v1086_v45 = vmul.f32 1.442695, %v2658_v5 }
 0x336   :  { %1717 = vpow2.f32 %v1084_v23  ;;  %v2662_v39 = vsub.f32 %v2530_v57, %v993_v32  ;;  %1134 = vadd.xlane.f32.xlu0 %v1708_v27  ;;  %v995_v38 = vpop.xlane.xlu0 %994 }
 0x337   :  { %1719 = vpow2.f32 %v1082_v10  ;;  %v2666_v2 = vsub.f32 %v2541_v29, %v995_v38 }
 0x338   :  { %v1710_v20 = vpop.eup %1709  ;;  %v1088_v6 = vmul.f32 1.442695, %v2662_v39 }
 0x339   :  { %v1712_v24 = vpop.eup %1711  ;;  %1140 = vadd.xlane.f32.xlu1 %v1710_v20  ;;  %v997_v12 = vpop.xlane.xlu1 %996  ;;  %v1090_v19 = vmul.f32 1.442695, %v2666_v2 }
 0x33a   :  { %1721 = vpow2.f32 %v1088_v6  ;;  %v2670_v8 = vsub.f32 %v2538_v21, %v997_v12  ;;  %1138 = vadd.xlane.f32.xlu0 %v1712_v24  ;;  %v999_v57 = vpop.xlane.xlu0 %998 }
 0x33b   :  { %1723 = vpow2.f32 %v1086_v45  ;;  %v2674_v7 = vsub.f32 %v2549_v30, %v999_v57 }
 0x33c   :  { %v1714_v29 = vpop.eup %1713  ;;  %v1092_v25 = vmul.f32 1.442695, %v2670_v8 }
 0x33d   :  { %v1716_v53 = vpop.eup %1715  ;;  %1144 = vadd.xlane.f32.xlu1 %v1714_v29  ;;  %v1001_v28 = vpop.xlane.xlu1 %1000  ;;  %v1094_v51 = vmul.f32 1.442695, %v2674_v7 }
 0x33e   :  { %1725 = vpow2.f32 %v1092_v25  ;;  %v2678_v4 = vsub.f32 %v2546_v44, %v1001_v28  ;;  %1142 = vadd.xlane.f32.xlu0 %v1716_v53  ;;  %v1003_v21 = vpop.xlane.xlu0 %1002 }
 0x33f   :  { %1727 = vpow2.f32 %v1090_v19  ;;  %v2682_v11 = vsub.f32 %v2557_v58, %v1003_v21 }
 0x340   :  { %v1718_v30 = vpop.eup %1717  ;;  %v1096_v59 = vmul.f32 1.442695, %v2678_v4 }
 0x341   :  { %v1720_v43 = vpop.eup %1719  ;;  %1148 = vadd.xlane.f32.xlu1 %v1718_v30  ;;  %v1005_v46 = vpop.xlane.xlu1 %1004  ;;  %v1098_v44 = vmul.f32 1.442695, %v2682_v11 }
 0x342   :  { %1729 = vpow2.f32 %v1096_v59  ;;  %v2686_v62 = vsub.f32 %v2554_v56, %v1005_v46  ;;  %1146 = vadd.xlane.f32.xlu0 %v1720_v43 }
 0x343   :  { %1731 = vpow2.f32 %v1094_v51 }
 0x344   :  { %v1722_v1 = vpop.eup %1721  ;;  %v1100_v15 = vmul.f32 1.442695, %v2686_v62 }
 0x345   :  { %v1724_v41 = vpop.eup %1723  ;;  %1152 = vadd.xlane.f32.xlu1 %v1722_v1 }
 0x346   :  { %1733 = vpow2.f32 %v1100_v15  ;;  %1150 = vadd.xlane.f32.xlu0 %v1724_v41 }
 0x347   :  { %1735 = vpow2.f32 %v1098_v44 }
 0x348   :  { %v1726_v58 = vpop.eup %1725 }
 0x349   :  { %v1728_v61 = vpop.eup %1727  ;;  %1156 = vadd.xlane.f32.xlu1 %v1726_v58 }
 0x34a   :  { %1154 = vadd.xlane.f32.xlu0 %v1728_v61 }
 0x34c   :  { %v1730_v3 = vpop.eup %1729 }
 0x34d   :  { %v1732_v13 = vpop.eup %1731  ;;  %1160 = vadd.xlane.f32.xlu1 %v1730_v3 }
 0x34e   :  { %1158 = vadd.xlane.f32.xlu0 %v1732_v13 }
 0x350   :  { %v1734_v56 = vpop.eup %1733 }
 0x351   :  { %v1736_v10 = vpop.eup %1735  ;;  %1164 = vadd.xlane.f32.xlu1 %v1734_v56 }
 0x352   :  { %1162 = vadd.xlane.f32.xlu0 %v1736_v10 }
 0x39e   :  { %v1105_v17 = vpop.xlane.xlu1 %1104 }
 0x39f   :  { %1737 = vlog2.f32 %v1105_v17 }
 0x3a2   :  { %v1109_v23 = vpop.xlane.xlu1 %1108 }
 0x3a3   :  { %1739 = vlog2.f32 %v1109_v23  ;;  %v1103_v27 = vpop.xlane.xlu0 %1102 }
 0x3a4   :  { %1741 = vlog2.f32 %v1103_v27 }
 0x3a7   :  { %v1107_v32 = vpop.xlane.xlu0 %1106 }
 0x3a8   :  { %1743 = vlog2.f32 %v1107_v32 }
 0x3a9   :  { %v1738_v38 = vpop.eup %1737 }
 0x3aa   :  { %v1169_v45 = vmul.f32 0.6931472, %v1738_v38  ;;  %v1113_v20 = vpop.xlane.xlu1 %1112 }
 0x3ab   :  { %1745 = vlog2.f32 %v1113_v20  ;;  %v1111_v6 = vpop.xlane.xlu0 %1110 }
 0x3ac   :  { %v1231_v24 = vsub.f32 %v2563_v0, %v1169_v45  ;;  %1747 = vlog2.f32 %v1111_v6 }
 0x3ad   :  { %v1740_v12 = vpop.eup %1739 }
 0x3ae   :  { %v1742_v57 = vpop.eup %1741  ;;  %1264 = vst.msk [vmem:[%s2854_s4 + $0x8] sm:$0xff] %vm1262_vm1, %v1231_v24  ;;  %v1173_v19 = vmul.f32 0.6931472, %v1740_v12  ;;  %v1117_v29 = vpop.xlane.xlu1 %1116 }
 0x3af   :  { %v1167_v25 = vmul.f32 0.6931472, %v1742_v57  ;;  %1749 = vlog2.f32 %v1117_v29  ;;  %v1115_v53 = vpop.xlane.xlu0 %1114 }
 0x3b0   :  { %v1233_v28 = vsub.f32 %v2567_v14, %v1173_v19  ;;  %1751 = vlog2.f32 %v1115_v53 }
 0x3b1   :  { %v1230_v21 = vsub.f32 %v2570_v54, %v1167_v25 }
 0x3b2   :  { %v1744_v51 = vpop.eup %1743  ;;  %1266 = vst.msk [vmem:[%s2854_s4 + $0x18] sm:$0xff] %vm1262_vm1, %v1233_v28  ;;  %v1121_v0 = vpop.xlane.xlu1 %1120 }
 0x3b3   :  { %1263 = vst.msk [vmem:[%s2854_s4] sm:$0xff] %vm1262_vm1, %v1230_v21  ;;  %v1171_v30 = vmul.f32 0.6931472, %v1744_v51  ;;  %1753 = vlog2.f32 %v1121_v0  ;;  %v1119_v59 = vpop.xlane.xlu0 %1118 }
 0x3b4   :  { %1755 = vlog2.f32 %v1119_v59 }
 0x3b5   :  { %v1746_v14 = vpop.eup %1745  ;;  %v1232_v43 = vsub.f32 %v2575_v35, %v1171_v30 }
 0x3b6   :  { %v1748_v54 = vpop.eup %1747  ;;  %v1177_v46 = vmul.f32 0.6931472, %v1746_v14  ;;  %v1125_v44 = vpop.xlane.xlu1 %1124 }
 0x3b7   :  { %1265 = vst.msk [vmem:[%s2854_s4 + $0x10] sm:$0xff] %vm1262_vm1, %v1232_v43  ;;  %v1175_v1 = vmul.f32 0.6931472, %v1748_v54  ;;  %1757 = vlog2.f32 %v1125_v44  ;;  %v1123_v15 = vpop.xlane.xlu0 %1122 }
 0x3b8   :  { %v1235_v41 = vsub.f32 %v2582_v42, %v1177_v46  ;;  %1759 = vlog2.f32 %v1123_v15 }
 0x3b9   :  { %v1750_v58 = vpop.eup %1749  ;;  %v1234_v61 = vsub.f32 %v2578_v36, %v1175_v1 }
 0x3ba   :  { %v1752_v3 = vpop.eup %1751  ;;  %1268 = vst.msk [vmem:[%s2854_s4 + $0x28] sm:$0xff] %vm1262_vm1, %v1235_v41  ;;  %v1181_v35 = vmul.f32 0.6931472, %v1750_v58  ;;  %v1129_v13 = vpop.xlane.xlu1 %1128 }
 0x3bb   :  { %1267 = vst.msk [vmem:[%s2854_s4 + $0x20] sm:$0xff] %vm1262_vm1, %v1234_v61  ;;  %v1179_v56 = vmul.f32 0.6931472, %v1752_v3  ;;  %1761 = vlog2.f32 %v1129_v13  ;;  %v1127_v42 = vpop.xlane.xlu0 %1126 }
 0x3bc   :  { %v1237_v10 = vsub.f32 %v2590_v50, %v1181_v35  ;;  %1763 = vlog2.f32 %v1127_v42 }
 0x3bd   :  { %v1754_v36 = vpop.eup %1753  ;;  %v1236_v17 = vsub.f32 %v2586_v9, %v1179_v56 }
 0x3be   :  { %v1756_v23 = vpop.eup %1755  ;;  %1270 = vst.msk [vmem:[%s2854_s4 + $0x38] sm:$0xff] %vm1262_vm1, %v1237_v10  ;;  %v1185_v27 = vmul.f32 0.6931472, %v1754_v36  ;;  %v1133_v32 = vpop.xlane.xlu1 %1132 }
 0x3bf   :  { %1269 = vst.msk [vmem:[%s2854_s4 + $0x30] sm:$0xff] %vm1262_vm1, %v1236_v17  ;;  %v1183_v38 = vmul.f32 0.6931472, %v1756_v23  ;;  %1765 = vlog2.f32 %v1133_v32  ;;  %v1131_v50 = vpop.xlane.xlu0 %1130 }
 0x3c0   :  { %v1239_v45 = vsub.f32 %v2598_v34, %v1185_v27  ;;  %1767 = vlog2.f32 %v1131_v50 }
 0x3c1   :  { %v1758_v9 = vpop.eup %1757  ;;  %v1238_v20 = vsub.f32 %v2594_v22, %v1183_v38 }
 0x3c2   :  { %v1760_v6 = vpop.eup %1759  ;;  %1272 = vst.msk [vmem:[%s2854_s4 + $0x48] sm:$0xff] %vm1262_vm1, %v1239_v45  ;;  %v1189_v24 = vmul.f32 0.6931472, %v1758_v9  ;;  %v1137_v12 = vpop.xlane.xlu1 %1136 }
 0x3c3   :  { %1271 = vst.msk [vmem:[%s2854_s4 + $0x40] sm:$0xff] %vm1262_vm1, %v1238_v20  ;;  %v1187_v57 = vmul.f32 0.6931472, %v1760_v6  ;;  %1769 = vlog2.f32 %v1137_v12  ;;  %v1135_v34 = vpop.xlane.xlu0 %1134 }
 0x3c4   :  { %v1241_v19 = vsub.f32 %v2606_v49, %v1189_v24  ;;  %1771 = vlog2.f32 %v1135_v34 }
 0x3c5   :  { %v1762_v22 = vpop.eup %1761  ;;  %v1240_v29 = vsub.f32 %v2602_v40, %v1187_v57 }
 0x3c6   :  { %v1764_v25 = vpop.eup %1763  ;;  %1274 = vst.msk [vmem:[%s2854_s4 + $0x58] sm:$0xff] %vm1262_vm1, %v1241_v19  ;;  %v1193_v53 = vmul.f32 0.6931472, %v1762_v22  ;;  %v1141_v28 = vpop.xlane.xlu1 %1140 }
 0x3c7   :  { %1273 = vst.msk [vmem:[%s2854_s4 + $0x50] sm:$0xff] %vm1262_vm1, %v1240_v29  ;;  %v1191_v21 = vmul.f32 0.6931472, %v1764_v25  ;;  %1773 = vlog2.f32 %v1141_v28  ;;  %v1139_v49 = vpop.xlane.xlu0 %1138 }
 0x3c8   :  { %v1243_v51 = vsub.f32 %v2614_v26, %v1193_v53  ;;  %1775 = vlog2.f32 %v1139_v49 }
 0x3c9   :  { %v1766_v40 = vpop.eup %1765  ;;  %v1242_v0 = vsub.f32 %v2610_v55, %v1191_v21 }
 0x3ca   :  { %v1768_v30 = vpop.eup %1767  ;;  %1276 = vst.msk [vmem:[%s2854_s4 + $0x68] sm:$0xff] %vm1262_vm1, %v1243_v51  ;;  %v1197_v59 = vmul.f32 0.6931472, %v1766_v40  ;;  %v1145_v14 = vpop.xlane.xlu1 %1144 }
 0x3cb   :  { %1275 = vst.msk [vmem:[%s2854_s4 + $0x60] sm:$0xff] %vm1262_vm1, %v1242_v0  ;;  %v1195_v43 = vmul.f32 0.6931472, %v1768_v30  ;;  %1777 = vlog2.f32 %v1145_v14  ;;  %v1143_v26 = vpop.xlane.xlu0 %1142 }
 0x3cc   :  { %v1245_v54 = vsub.f32 %v2622_v47, %v1197_v59  ;;  %1779 = vlog2.f32 %v1143_v26 }
 0x3cd   :  { %v1770_v55 = vpop.eup %1769  ;;  %v1244_v46 = vsub.f32 %v2618_v18, %v1195_v43 }
 0x3ce   :  { %v1772_v44 = vpop.eup %1771  ;;  %1278 = vst.msk [vmem:[%s2854_s4 + $0x78] sm:$0xff] %vm1262_vm1, %v1245_v54  ;;  %v1201_v1 = vmul.f32 0.6931472, %v1770_v55  ;;  %v1149_v15 = vpop.xlane.xlu1 %1148 }
 0x3cf   :  { %1277 = vst.msk [vmem:[%s2854_s4 + $0x70] sm:$0xff] %vm1262_vm1, %v1244_v46  ;;  %v1199_v41 = vmul.f32 0.6931472, %v1772_v44  ;;  %1781 = vlog2.f32 %v1149_v15  ;;  %v1147_v47 = vpop.xlane.xlu0 %1146 }
 0x3d0   :  { %v1247_v58 = vsub.f32 %v2630_v16, %v1201_v1  ;;  %1783 = vlog2.f32 %v1147_v47 }
 0x3d1   :  { %v1774_v18 = vpop.eup %1773  ;;  %v1246_v61 = vsub.f32 %v2626_v63, %v1199_v41 }
 0x3d2   :  { %v1776_v3 = vpop.eup %1775  ;;  %1280 = vst.msk [vmem:[%s2854_s4 + $0x88] sm:$0xff] %vm1262_vm1, %v1247_v58  ;;  %v1205_v35 = vmul.f32 0.6931472, %v1774_v18  ;;  %v1153_v13 = vpop.xlane.xlu1 %1152 }
 0x3d3   :  { %1279 = vst.msk [vmem:[%s2854_s4 + $0x80] sm:$0xff] %vm1262_vm1, %v1246_v61  ;;  %v1203_v56 = vmul.f32 0.6931472, %v1776_v3  ;;  %1785 = vlog2.f32 %v1153_v13  ;;  %v1151_v16 = vpop.xlane.xlu0 %1150 }
 0x3d4   :  { %v1249_v42 = vsub.f32 %v2638_v31, %v1205_v35  ;;  %1787 = vlog2.f32 %v1151_v16 }
 0x3d5   :  { %v1778_v63 = vpop.eup %1777  ;;  %v1248_v10 = vsub.f32 %v2634_v48, %v1203_v56 }
 0x3d6   :  { %v1780_v36 = vpop.eup %1779  ;;  %1282 = vst.msk [vmem:[%s2854_s4 + $0x98] sm:$0xff] %vm1262_vm1, %v1249_v42  ;;  %v1209_v17 = vmul.f32 0.6931472, %v1778_v63  ;;  %v1157_v23 = vpop.xlane.xlu1 %1156 }
 0x3d7   :  { %1281 = vst.msk [vmem:[%s2854_s4 + $0x90] sm:$0xff] %vm1262_vm1, %v1248_v10  ;;  %v1207_v27 = vmul.f32 0.6931472, %v1780_v36  ;;  %1789 = vlog2.f32 %v1157_v23  ;;  %v1155_v31 = vpop.xlane.xlu0 %1154 }
 0x3d8   :  { %v1251_v32 = vsub.f32 %v2646_v52, %v1209_v17  ;;  %1791 = vlog2.f32 %v1155_v31 }
 0x3d9   :  { %v1782_v48 = vpop.eup %1781  ;;  %v1250_v38 = vsub.f32 %v2642_v37, %v1207_v27 }
 0x3da   :  { %v1784_v50 = vpop.eup %1783  ;;  %1284 = vst.msk [vmem:[%s2854_s4 + $0xa8] sm:$0xff] %vm1262_vm1, %v1251_v32  ;;  %v1213_v45 = vmul.f32 0.6931472, %v1782_v48  ;;  %v1161_v9 = vpop.xlane.xlu1 %1160 }
 0x3db   :  { %1283 = vst.msk [vmem:[%s2854_s4 + $0xa0] sm:$0xff] %vm1262_vm1, %v1250_v38  ;;  %v1211_v20 = vmul.f32 0.6931472, %v1784_v50  ;;  %1793 = vlog2.f32 %v1161_v9  ;;  %v1159_v52 = vpop.xlane.xlu0 %1158 }
 0x3dc   :  { %v1253_v6 = vsub.f32 %v2654_v60, %v1213_v45  ;;  %1795 = vlog2.f32 %v1159_v52 }
 0x3dd   :  { %v1786_v37 = vpop.eup %1785  ;;  %v1252_v24 = vsub.f32 %v2650_v33, %v1211_v20 }
 0x3de   :  { %v1788_v12 = vpop.eup %1787  ;;  %1286 = vst.msk [vmem:[%s2854_s4 + $0xb8] sm:$0xff] %vm1262_vm1, %v1253_v6  ;;  %v1217_v57 = vmul.f32 0.6931472, %v1786_v37  ;;  %v1165_v34 = vpop.xlane.xlu1 %1164 }
 0x3df   :  { %1285 = vst.msk [vmem:[%s2854_s4 + $0xb0] sm:$0xff] %vm1262_vm1, %v1252_v24  ;;  %v1215_v19 = vmul.f32 0.6931472, %v1788_v12  ;;  %1797 = vlog2.f32 %v1165_v34  ;;  %v1163_v60 = vpop.xlane.xlu0 %1162 }
 0x3e0   :  { %v1255_v22 = vsub.f32 %v2662_v39, %v1217_v57  ;;  %1799 = vlog2.f32 %v1163_v60 }
 0x3e1   :  { %v1790_v33 = vpop.eup %1789  ;;  %v1254_v29 = vsub.f32 %v2658_v5, %v1215_v19 }
 0x3e2   :  { %v1792_v25 = vpop.eup %1791  ;;  %1288 = vst.msk [vmem:[%s2854_s4 + $0xc8] sm:$0xff] %vm1262_vm1, %v1255_v22  ;;  %v1221_v53 = vmul.f32 0.6931472, %v1790_v33 }
 0x3e3   :  { %1287 = vst.msk [vmem:[%s2854_s4 + $0xc0] sm:$0xff] %vm1262_vm1, %v1254_v29  ;;  %v1219_v28 = vmul.f32 0.6931472, %v1792_v25 }
 0x3e4   :  { %v1257_v21 = vsub.f32 %v2670_v8, %v1221_v53 }
 0x3e5   :  { %v1794_v39 = vpop.eup %1793  ;;  %v1256_v49 = vsub.f32 %v2666_v2, %v1219_v28 }
 0x3e6   :  { %v1796_v51 = vpop.eup %1795  ;;  %1290 = vst.msk [vmem:[%s2854_s4 + $0xd8] sm:$0xff] %vm1262_vm1, %v1257_v21  ;;  %v1225_v5 = vmul.f32 0.6931472, %v1794_v39 }
 0x3e7   :  { %1289 = vst.msk [vmem:[%s2854_s4 + $0xd0] sm:$0xff] %vm1262_vm1, %v1256_v49  ;;  %v1223_v40 = vmul.f32 0.6931472, %v1796_v51 }
 0x3e8   :  { %v1259_v0 = vsub.f32 %v2678_v4, %v1225_v5 }
 0x3e9   :  { %v1798_v30 = vpop.eup %1797  ;;  %v1258_v8 = vsub.f32 %v2674_v7, %v1223_v40 }
 0x3ea   :  { %v1800_v59 = vpop.eup %1799  ;;  %1292 = vst.msk [vmem:[%s2854_s4 + $0xe8] sm:$0xff] %vm1262_vm1, %v1259_v0  ;;  %v1229_v2 = vmul.f32 0.6931472, %v1798_v30 }
 0x3eb   :  { %1291 = vst.msk [vmem:[%s2854_s4 + $0xe0] sm:$0xff] %vm1262_vm1, %v1258_v8  ;;  %v1227_v14 = vmul.f32 0.6931472, %v1800_v59 }
 0x3ec   :  { %v1261_v43 = vsub.f32 %v2686_v62, %v1229_v2 }
 0x3ed   :  { %v1260_v4 = vsub.f32 %v2682_v11, %v1227_v14 }
 0x3ee   :  { %1294 = vst.msk [vmem:[%s2854_s4 + $0xf8] sm:$0xff] %vm1262_vm1, %v1261_v43 }
 0x3ef   :  { %1293 = vst.msk [vmem:[%s2854_s4 + $0xf0] sm:$0xff] %vm1262_vm1, %v1260_v4 }

</bundles_post_ra>
